<compile_context>
chip_gen: v5e
topology: v5e:2x2
jax: 0.10.0
libtpu: 0.0.40
codegen_flags: <defaults>
</compile_context>

<pallas_src>
import functools
import math

import jax
import jax.numpy as jnp
from jax.experimental import pallas as pl
from jax.experimental.pallas import tpu as pltpu

_INV_SQRT2 = 1.0 / math.sqrt(2.0)


def _round_up(x, m):
    return (x + m - 1) // m * m


def _gelu(h, approximate):
    if approximate:
        # tanh approximation routes the transcendental to the EUP slot.
        return jax.nn.gelu(h, approximate=True)
    # exact (erf-based) GELU in f32, matching torch.nn.GELU() default.
    return 0.5 * h * (1.0 + jax.lax.erf(h * _INV_SQRT2))


# ---------------------------------------------------------------------------
# Fast path: W1/W2/b1/b2 fully resident in VMEM, single "parallel" row axis.
# ---------------------------------------------------------------------------
def _mlp_kernel_resident(x_ref, w1_ref, b1_ref, w2_ref, b2_ref, o_ref, *, approximate):
    # x_ref : (tm, C_in)  orig dtype     w1_ref: (C_in, H) bf16    b1_ref: (1, H) f32
    # w2_ref: (H, C_out_p) bf16          b2_ref: (1, C_out_p) f32  o_ref : (tm, C_out_p)
    x = x_ref[...].astype(w1_ref.dtype)              # in-kernel cast, hidden under MXU
    h = jnp.dot(x, w1_ref[...], preferred_element_type=jnp.float32) + b1_ref[...]
    h = _gelu(h, approximate)
    # dropout(p=0.0) is the identity -> skipped.
    o = jnp.dot(h.astype(w2_ref.dtype), w2_ref[...],
                preferred_element_type=jnp.float32) + b2_ref[...]
    o_ref[...] = o.astype(o_ref.dtype)


# ---------------------------------------------------------------------------
# Fallback path: hidden dim blocked along a second "arbitrary" grid axis with a
# resident f32 accumulator (first k step assigns; no zero-fill pass).
# ---------------------------------------------------------------------------
def _mlp_kernel_streamed(x_ref, w1_ref, b1_ref, w2_ref, b2_ref, o_ref, acc_ref,
                         *, tk, approximate):
    # x_ref : (tm, C_in)   w1_ref: (C_in, tk)   b1_ref: (1, H_p)  (full, sliced below)
    # w2_ref: (tk, C_out_p)  b2_ref: (1, C_out_p)  o_ref: (tm, C_out_p)
    # acc_ref: (tm, C_out_p) f32 scratch, resident across the H (k) axis.
    k = pl.program_id(1)

    x = x_ref[...].astype(w1_ref.dtype)
    h = jnp.dot(x, w1_ref[...], preferred_element_type=jnp.float32)
    h = h + b1_ref[:, pl.ds(pl.multiple_of(k * tk, 128), tk)]
    h = _gelu(h, approximate)

    part = jnp.dot(h.astype(w2_ref.dtype), w2_ref[...],
                   preferred_element_type=jnp.float32)

    @pl.when(k == 0)
    def _():
        acc_ref[...] = part

    @pl.when(k > 0)
    def _():
        acc_ref[...] += part

    @pl.when(k == pl.num_programs(1) - 1)
    def _():
        o_ref[...] = (acc_ref[...] + b2_ref[...]).astype(o_ref.dtype)


def mlp_pallas(x, w1, b1, w2, b2, *, tile_m=256, tile_h=512,
               compute_dtype=jnp.bfloat16, approximate_gelu=False,
               force_streamed=False):
    """x: (..., C_in). w1: (C_in, H), b1: (H,), w2: (H, C_out), b2: (C_out,)."""
    orig_dtype = x.dtype
    *lead, C_in = x.shape
    H = w1.shape[1]
    C_out = w2.shape[1]
    M = 1
    for d in lead:
        M *= int(d)

    cbytes = jnp.dtype(compute_dtype).itemsize
    xbytes = jnp.dtype(orig_dtype).itemsize
    obytes = jnp.dtype(orig_dtype).itemsize

    C_in_v = _round_up(C_in, 128)      # VMEM footprint of the (unpadded) channel dim
    C_out_p = _round_up(C_out, 128)    # lane-dense output stores
    H_128 = _round_up(H, 128)
    M_r = _round_up(max(M, 1), 16)

    # ---- generation-aware VMEM budget --------------------------------------
    try:
        vmem_cap = int(pltpu.get_tpu_info().vmem_capacity_bytes)
    except Exception:
        vmem_cap = 64 << 20            # conservative fallback (v7x per-TC VMEM)
    vmem_budget = max(int(vmem_cap * 0.8), 16 << 20)

    row_candidates = [c for c in (1024, 768, 640, 512, 384, 256, 192, 128, 96, 64, 48, 32, 16)
                      if c <= M_r] or [16]

    # ---------------------------- resident fast path ------------------------
    def resident_bytes(tm):
        return (
            2 * tm * C_in_v * xbytes                           # x tile (double-buffered)
            + 2 * tm * C_out_p * obytes                        # out tile
            + 2 * (C_in_v * H_128 + H_128 * C_out_p) * cbytes  # W1 + W2 (x2 buffers, worst case)
            + 2 * 8 * (H_128 + C_out_p) * 4                    # biases (sublane-padded f32)
            + tm * H_128 * (4 + cbytes)                        # live f32/bf16 hidden activation
            + tm * (C_out_p * 4 + C_in_v * cbytes)             # live f32 out + bf16 x cast
            + (2 << 20)                                        # slack
        )

    tm_res = None
    if not force_streamed:
        for c in row_candidates:
            if c <= max(int(tile_m), 16) and resident_bytes(c) <= vmem_budget:
                tm_res = c
                break

    if tm_res is not None:
        tm = tm_res
        M_p = _round_up(M, tm)

        x2 = x.reshape(M, C_in)
        if M_p != M:
            x2 = jnp.pad(x2, ((0, M_p - M), (0, 0)))
        w1_c = w1.astype(compute_dtype)
        b1_c = b1.astype(jnp.float32).reshape(1, H)
        w2_c = w2.astype(compute_dtype)
        b2_c = b2.astype(jnp.float32)
        if C_out_p != C_out:
            w2_c = jnp.pad(w2_c, ((0, 0), (0, C_out_p - C_out)))
            b2_c = jnp.pad(b2_c, (0, C_out_p - C_out))
        b2_c = b2_c.reshape(1, C_out_p)

        cost = pl.CostEstimate(
            flops=2 * M_p * (C_in * H + H * C_out_p),
            transcendentals=M_p * H,
            bytes_accessed=(M_p * C_in * xbytes
                            + (C_in * H + H * C_out_p) * cbytes
                            + (H + C_out_p) * 4
                            + M_p * C_out_p * obytes),
        )

        kernel = functools.partial(_mlp_kernel_resident, approximate=approximate_gelu)
        out = pl.pallas_call(
            kernel,
            out_shape=jax.ShapeDtypeStruct((M_p, C_out_p), orig_dtype),
            grid_spec=pltpu.PrefetchScalarGridSpec(
                num_scalar_prefetch=0,
                grid=(M_p // tm,),
                in_specs=[
                    pl.BlockSpec((tm, C_in), lambda i: (i, 0)),      # x rows
                    pl.BlockSpec((C_in, H), lambda i: (0, 0)),       # W1 (resident, DMA'd once)
                    pl.BlockSpec((1, H), lambda i: (0, 0)),          # b1
                    pl.BlockSpec((H, C_out_p), lambda i: (0, 0)),    # W2 (resident)
                    pl.BlockSpec((1, C_out_p), lambda i: (0, 0)),    # b2
                ],
                out_specs=pl.BlockSpec((tm, C_out_p), lambda i: (i, 0)),
            ),
            compiler_params=pltpu.CompilerParams(
                dimension_semantics=("parallel",),
                vmem_limit_bytes=vmem_budget,
            ),
            cost_estimate=cost,
        )(x2, w1_c, b1_c, w2_c, b2_c)

        return out[:M, :C_out].reshape(*lead, C_out)

    # ---------------------------- streamed fallback --------------------------
    def streamed_bytes(tm, tk):
        return (
            2 * tm * C_in_v * xbytes
            + 2 * tm * C_out_p * obytes
            + 2 * (C_in_v * tk + tk * C_out_p) * cbytes     # W1/W2 H-blocks (double-buffered)
            + 2 * 8 * (H_128 + C_out_p) * 4                 # biases (b1 full, resident)
            + tm * C_out_p * 4                              # f32 accumulator scratch
            + tm * tk * (4 + cbytes)                        # live hidden activation
            + tm * C_in_v * cbytes                          # bf16 x cast
            + (2 << 20)
        )

    tile_h = _round_up(max(int(tile_h), 128), 128)
    divisors = [d for d in range(128, H_128 + 1, 128) if H_128 % d == 0]
    tk_opts = [d for d in divisors if streamed_bytes(16, d) <= vmem_budget] or [divisors[0]]
    tk = min(tk_opts, key=lambda d: (abs(d - tile_h), d))   # no near-empty trailing H block
    H_p = H_128

    # Row tile as large as the budget allows: with streamed weights the arithmetic
    # intensity is ~tm flops per weight byte, so bigger tm -> MXU-bound on v6e/v7x.
    tm = next((c for c in row_candidates if streamed_bytes(c, tk) <= vmem_budget),
              row_candidates[-1])
    M_p = _round_up(M, tm)
    grid = (M_p // tm, H_p // tk)

    x2 = x.reshape(M, C_in)
    if M_p != M:
        x2 = jnp.pad(x2, ((0, M_p - M), (0, 0)))
    w1_p = w1.astype(compute_dtype)
    b1_p = b1.astype(jnp.float32)
    w2_p = w2.astype(compute_dtype)
    b2_p = b2.astype(jnp.float32)
    if H_p != H:
        w1_p = jnp.pad(w1_p, ((0, 0), (0, H_p - H)))
        b1_p = jnp.pad(b1_p, (0, H_p - H))
        w2_p = jnp.pad(w2_p, ((0, H_p - H), (0, 0)))
    if C_out_p != C_out:
        w2_p = jnp.pad(w2_p, ((0, 0), (0, C_out_p - C_out)))
        b2_p = jnp.pad(b2_p, (0, C_out_p - C_out))
    b1_p = b1_p.reshape(1, H_p)
    b2_p = b2_p.reshape(1, C_out_p)

    cost = pl.CostEstimate(
        flops=2 * M_p * (C_in * H_p + H_p * C_out_p),
        transcendentals=M_p * H_p,
        bytes_accessed=(M_p * C_in * xbytes
                        + grid[0] * (C_in * H_p + H_p * C_out_p) * cbytes
                        + (H_p + C_out_p) * 4
                        + M_p * C_out_p * obytes),
    )

    kernel = functools.partial(_mlp_kernel_streamed, tk=tk, approximate=approximate_gelu)
    # TODO(synk): if weight DMA is still exposed here, sweep pipeline_mode=pl.Buffered(3)
    # on the W1/W2 BlockSpecs once VMEM headroom is known.
    out = pl.pallas_call(
        kernel,
        out_shape=jax.ShapeDtypeStruct((M_p, C_out_p), orig_dtype),
        grid_spec=pltpu.PrefetchScalarGridSpec(
            num_scalar_prefetch=0,
            grid=grid,
            in_specs=[
                pl.BlockSpec((tm, C_in), lambda i, k: (i, 0)),      # x rows (resident over k)
                pl.BlockSpec((C_in, tk), lambda i, k: (0, k)),      # W1 H-block
                pl.BlockSpec((1, H_p), lambda i, k: (0, 0)),        # b1 (full, sliced in kernel)
                pl.BlockSpec((tk, C_out_p), lambda i, k: (k, 0)),   # W2 H-block
                pl.BlockSpec((1, C_out_p), lambda i, k: (0, 0)),    # b2 (constant)
            ],
            out_specs=pl.BlockSpec((tm, C_out_p), lambda i, k: (i, 0)),
            scratch_shapes=[pltpu.VMEM((tm, C_out_p), jnp.float32)],
        ),
        compiler_params=pltpu.CompilerParams(
            dimension_semantics=("parallel", "arbitrary"),
            vmem_limit_bytes=vmem_budget,
        ),
        cost_estimate=cost,
    )(x2, w1_p, b1_p, w2_p, b2_p)

    return out[:M, :C_out].reshape(*lead, C_out)


def _init_linear(key, in_f, out_f, dtype=jnp.float32):
    # Mimic torch.nn.Linear init: U(-1/sqrt(in_f), 1/sqrt(in_f)) for weight and bias.
    kw, kb = jax.random.split(key)
    bound = 1.0 / math.sqrt(in_f)
    # stored already transposed for (rows, in) @ (in, out)
    w = jax.random.uniform(kw, (in_f, out_f), dtype, minval=-bound, maxval=bound)
    b = jax.random.uniform(kb, (out_f,), dtype, minval=-bound, maxval=bound)
    return w, b


if __name__ == "__main__":
    key = jax.random.PRNGKey(0)
    k_x, k_fc1, k_fc2 = jax.random.split(key, 3)

    # small shapes consistent with the module: tokens (B, N, C_in)
    B, N = 2, 256
    in_features, hidden_features, out_features = 32, 128, 32

    x = jax.random.normal(k_x, (B, N, in_features), jnp.float32)
    w1, b1 = _init_linear(k_fc1, in_features, hidden_features)
    w2, b2 = _init_linear(k_fc2, hidden_features, out_features)

    # --- main path (weights-resident fast path for these sizes) -------------
    mlp = jax.jit(functools.partial(mlp_pallas, tile_m=256, tile_h=512))
    y = jax.block_until_ready(mlp(x, w1, b1, w2, b2))

    # reference #1: mirrors kernel precision (bf16 MXU operands, f32 accumulation)
    cd = jnp.bfloat16
    x2 = x.reshape(-1, in_features)
    h_m = jnp.dot(x2.astype(cd), w1.astype(cd), preferred_element_type=jnp.float32) + b1
    h_m = 0.5 * h_m * (1.0 + jax.lax.erf(h_m * _INV_SQRT2))
    y_m = jnp.dot(h_m.astype(cd), w2.astype(cd), preferred_element_type=jnp.float32) + b2
    y_m = y_m.reshape(B, N, out_features).astype(x.dtype)
    assert jnp.allclose(y, y_m, atol=2e-3, rtol=2e-3), "mismatch vs bf16-mirrored reference"

    # reference #2: full f32 semantics of the torch module (looser mixed-precision tol)
    h_f = jax.nn.gelu(x @ w1 + b1, approximate=False)
    y_f = h_f @ w2 + b2
    assert jnp.allclose(y, y_f, atol=5e-2, rtol=5e-2), "mismatch vs f32 reference"

    # --- explicitly exercise the streamed (H-blocked) fallback path ----------
    hidden_big = 256
    w1b, b1b = _init_linear(k_fc1, in_features, hidden_big)
    w2b, b2b = _init_linear(k_fc2, hidden_big, out_features)
    mlp_s = jax.jit(functools.partial(mlp_pallas, tile_m=256, tile_h=128,
                                      force_streamed=True))
    y_s = jax.block_until_ready(mlp_s(x, w1b, b1b, w2b, b2b))
    h_r = jax.nn.gelu(x @ w1b + b1b, approximate=False)
    y_r = h_r @ w2b + b2b
    assert jnp.allclose(y_s, y_r, atol=5e-2, rtol=5e-2), "mismatch vs f32 ref (streamed path)"

    print("KERNEL_OK")
</pallas_src>

<mosaic_0001>
module attributes {stable_mosaic.version = 11 : i64} {
  func.func @_mlp_kernel_resident(%arg0: i32, %arg1: memref<256x32xf32, #tpu.memory_space<vmem>>, %arg2: memref<32x128xbf16, #tpu.memory_space<vmem>>, %arg3: memref<1x128xf32, #tpu.memory_space<vmem>>, %arg4: memref<128x128xbf16, #tpu.memory_space<vmem>>, %arg5: memref<1x128xf32, #tpu.memory_space<vmem>>, %arg6: memref<256x128xf32, #tpu.memory_space<vmem>>) attributes {dimension_semantics = [#tpu.dimension_semantics<parallel>], iteration_bounds = array<i64: 2>, scalar_prefetch = 0 : i64, scratch_operands = 0 : i64, tpu.core_type = #tpu.core_type<tc>, window_params = [{transform_indices = @transform_0, window_bounds = array<i64: 256, 32>}, {pipeline_mode = #tpu.pipeline_mode<synchronous>, transform_indices = @transform_1, window_bounds = array<i64: 32, 128>}, {pipeline_mode = #tpu.pipeline_mode<synchronous>, transform_indices = @transform_2, window_bounds = array<i64: 1, 128>}, {pipeline_mode = #tpu.pipeline_mode<synchronous>, transform_indices = @transform_3, window_bounds = array<i64: 128, 128>}, {pipeline_mode = #tpu.pipeline_mode<synchronous>, transform_indices = @transform_4, window_bounds = array<i64: 1, 128>}, {transform_indices = @transform_5, window_bounds = array<i64: 256, 128>}]} {
    %c0 = arith.constant 0 : index
    %c0_0 = arith.constant 0 : index
    %0 = vector.load %arg1[%c0, %c0_0] : memref<256x32xf32, #tpu.memory_space<vmem>>, vector<256x32xf32>
    %1 = arith.truncf %0 : vector<256x32xf32> to vector<256x32xbf16>
    %c0_1 = arith.constant 0 : index
    %c0_2 = arith.constant 0 : index
    %2 = vector.load %arg2[%c0_1, %c0_2] : memref<32x128xbf16, #tpu.memory_space<vmem>>, vector<32x128xbf16>
    %cst = arith.constant dense<0.000000e+00> : vector<256x128xf32>
    %3 = tpu.matmul %1, %2, %cst {dimension_numbers = #tpu.dot_dimension_numbers<[1], [0], [0], [1], [0, 0, 1, 1], [], []>} : vector<256x32xbf16>, vector<32x128xbf16>, vector<256x128xf32> -> vector<256x128xf32>
    %c0_3 = arith.constant 0 : index
    %c0_4 = arith.constant 0 : index
    %4 = vector.load %arg3[%c0_3, %c0_4] : memref<1x128xf32, #tpu.memory_space<vmem>>, vector<1x128xf32>
    %5 = vector.broadcast %4 : vector<1x128xf32> to vector<256x128xf32>
    %6 = arith.addf %3, %5 : vector<256x128xf32>
    %cst_5 = arith.constant 5.000000e-01 : f32
    %7 = vector.broadcast %cst_5 : f32 to vector<256x128xf32>
    %8 = arith.mulf %7, %6 : vector<256x128xf32>
    %cst_6 = arith.constant 0.707106769 : f32
    %9 = vector.broadcast %cst_6 : f32 to vector<256x128xf32>
    %10 = arith.mulf %6, %9 : vector<256x128xf32>
    %11 = math.erf %10 : vector<256x128xf32>
    %cst_7 = arith.constant 1.000000e+00 : f32
    %12 = vector.broadcast %cst_7 : f32 to vector<256x128xf32>
    %13 = arith.addf %12, %11 : vector<256x128xf32>
    %14 = arith.mulf %8, %13 : vector<256x128xf32>
    %15 = arith.truncf %14 : vector<256x128xf32> to vector<256x128xbf16>
    %c0_8 = arith.constant 0 : index
    %c0_9 = arith.constant 0 : index
    %16 = vector.load %arg4[%c0_8, %c0_9] : memref<128x128xbf16, #tpu.memory_space<vmem>>, vector<128x128xbf16>
    %cst_10 = arith.constant dense<0.000000e+00> : vector<256x128xf32>
    %17 = tpu.matmul %15, %16, %cst_10 {dimension_numbers = #tpu.dot_dimension_numbers<[1], [0], [0], [1], [0, 0, 1, 1], [], []>} : vector<256x128xbf16>, vector<128x128xbf16>, vector<256x128xf32> -> vector<256x128xf32>
    %c0_11 = arith.constant 0 : index
    %c0_12 = arith.constant 0 : index
    %18 = vector.load %arg5[%c0_11, %c0_12] : memref<1x128xf32, #tpu.memory_space<vmem>>, vector<1x128xf32>
    %19 = vector.broadcast %18 : vector<1x128xf32> to vector<256x128xf32>
    %20 = arith.addf %17, %19 : vector<256x128xf32>
    %c0_13 = arith.constant 0 : index
    %c0_14 = arith.constant 0 : index
    %21 = vector.load %arg6[%c0_13, %c0_14] : memref<256x128xf32, #tpu.memory_space<vmem>>, vector<256x128xf32>
    tpu.vector_store %arg6[%c0_13, %c0_14], %20 {strides = array<i32>} : memref<256x128xf32, #tpu.memory_space<vmem>>, vector<256x128xf32>,
    return
  }
  func.func @transform_0(%arg0: i32) -> (i32, i32) {
    %c0_i32 = arith.constant 0 : i32
    %c0_i32_0 = arith.constant 0 : i32
    return %arg0, %c0_i32 : i32, i32
  }
  func.func @transform_1(%arg0: i32) -> (i32, i32) {
    %c0_i32 = arith.constant 0 : i32
    %c0_i32_0 = arith.constant 0 : i32
    %c0_i32_1 = arith.constant 0 : i32
    return %c0_i32, %c0_i32_0 : i32, i32
  }
  func.func @transform_2(%arg0: i32) -> (i32, i32) {
    %c0_i32 = arith.constant 0 : i32
    %c0_i32_0 = arith.constant 0 : i32
    %c0_i32_1 = arith.constant 0 : i32
    return %c0_i32, %c0_i32_0 : i32, i32
  }
  func.func @transform_3(%arg0: i32) -> (i32, i32) {
    %c0_i32 = arith.constant 0 : i32
    %c0_i32_0 = arith.constant 0 : i32
    %c0_i32_1 = arith.constant 0 : i32
    return %c0_i32, %c0_i32_0 : i32, i32
  }
  func.func @transform_4(%arg0: i32) -> (i32, i32) {
    %c0_i32 = arith.constant 0 : i32
    %c0_i32_0 = arith.constant 0 : i32
    %c0_i32_1 = arith.constant 0 : i32
    return %c0_i32, %c0_i32_0 : i32, i32
  }
  func.func @transform_5(%arg0: i32) -> (i32, i32) {
    %c0_i32 = arith.constant 0 : i32
    %c0_i32_0 = arith.constant 0 : i32
    return %arg0, %c0_i32 : i32, i32
  }
}

</mosaic_0001>

<bundles_post_ra>
// kernel: mlp_pallas.1
= control target key start
LH: loop header
LB: loop body
LE: loop exit
PB: predicated region body
PF: predicated region fallthrough
CT: control target
= control target key end

     0   :  { %s2338_s18 = smov 0   ;;  %s3880_s0 = inlined_call_operand.vmem [shape: f32[512,32], index: 0, kind: input, shape index: {}]   ;;  %s3881_s1 = inlined_call_operand.vmem [shape: bf16[32,128], index: 1, kind: input, shape index: {}]   ;;  %s3882_s2 = inlined_call_operand.vmem [shape: f32[1,128], index: 2, kind: input, shape index: {}]   ;;  %s3883_s3 = inlined_call_operand.vmem [shape: bf16[128,128], index: 3, kind: input, shape index: {}]   ;;  %s3884_s4 = inlined_call_operand.vmem [shape: f32[1,128], index: 4, kind: input, shape index: {}]   ;;  %s3885_s5 = inlined_call_operand.vmem [shape: f32[512,128], index: 5, kind: output, shape index: {}]  }
   0x1 LB: > { %s2104_s19 = sadd.s32 4294967295, %s2306_s18   ;;  %p2108_p0 = scmp.ge.s32.totalorder %s2306_s18, 1  ;;  %s2306_s18 = sphi %s2338_s18, %s15_s18  }
   0x2   : > { %p188_p1 = scmp.lt.s32.totalorder %s2306_s18, 3 }
   0x4   : > { %p189_p2 = pnand %p2108_p0, %p188_p1 }
   0x6   : > { %192 = sbr.rel (%p189_p2) target bundleno = 680 (0x2a8), region = 40 }
   0xb   : > { %v2204_v0 = vld [vmem:[%s3881_s1 + $0x8] sm:$0xff]  ;;  %s2109_s22 = sshll.u32 %s2104_s19, 5  ;;  %v2203_v1 = vld [vmem:[%s3881_s1] sm:$0xff]  ;;  %vm297_vm0 = vcmask 261120   ;;  %v2212_v46 = vld [vmem:[%s3883_s3 + $0x38] sm:$0xff] }
   0xc   : > { %p217_p3 = scmp.lt.s32.totalorder %s2109_s22, 63  ;;  %352 = vmatpush.bf16.msra.mxu0 %v2204_v0  ;;  %2213 = vmatpush.bf16.msra.mxu3 %v2204_v0  ;;  %v2406_v43 = vld [vmem:[%s3882_s2] ss:$0 sm:$0xff]  ;;  %v2211_v49 = vld [vmem:[%s3883_s3 + $0x30] sm:$0xff]  ;;  %v2210_v56 = vld [vmem:[%s3883_s3 + $0x28] sm:$0xff] }
   0xd   : > { %1927 = vmatpush.bf16.msra.mxu1 %v2212_v46  ;;  %2215 = vmatpush.bf16.msra.mxu2 %v2212_v46  ;;  %v2209_v62 = vld [vmem:[%s3883_s3 + $0x20] sm:$0xff] }
   0xe   : > { %s3990_s22 = smov (!%p217_p3, %s2109_s22), 63 }
   0xf   : > { %s2110_s25 = sshll.u32 %s3990_s22, 3 }
  0x10   : > { %353 = vmatpush.bf16.msra.mxu0 %v2203_v1  ;;  %s2360_s28 = scalar_lea.vmem %s3880_s0, %s2110_s25  ;;  %2214 = vmatpush.bf16.msra.mxu3 %v2203_v1  ;;  %s3337_s6 = scalar_lea.vmem %s3885_s5, %s2110_s25 }
  0x11   : > { %v229_v2 = vld [vmem:[%s2360_s28] sm:$0xff]  ;;  %v230_v3 = vld [vmem:[%s2360_s28 + $0x8] sm:$0xff]  ;;  %v231_v5 = vld [vmem:[%s2360_s28 + $0x10] sm:$0xff]  ;;  %1928 = vmatpush.bf16.msra.mxu1 %v2211_v49  ;;  %2216 = vmatpush.bf16.msra.mxu2 %v2211_v49 }
  0x12   : > { %v261_v4 = vpack.c.bf16 %v230_v3, %v229_v2  ;;  %v232_v6 = vld [vmem:[%s2360_s28 + $0x18] sm:$0xff]  ;;  %v233_v8 = vld [vmem:[%s2360_s28 + $0x20] sm:$0xff]  ;;  %v234_v9 = vld [vmem:[%s2360_s28 + $0x28] sm:$0xff] }
  0x13   : > { %v262_v7 = vpack.c.bf16 %v232_v6, %v231_v5  ;;  %v263_v10 = vpack.c.bf16 %v234_v9, %v233_v8  ;;  %v235_v11 = vld [vmem:[%s2360_s28 + $0x30] sm:$0xff]  ;;  %v236_v12 = vld [vmem:[%s2360_s28 + $0x38] sm:$0xff]  ;;  %v237_v17 = vld [vmem:[%s2360_s28 + $0x40] sm:$0xff] }
  0x14   : > { %2121 = vmatmul.msk.bf16.vlgmr.msra.gmra.mxu0 %vm297_vm0, %v261_v4  ;;  %v264_v13 = vpack.c.bf16 %v236_v12, %v235_v11  ;;  %v247_v14 = vld [vmem:[%s2360_s28 + $0x90] sm:$0xff]  ;;  %v248_v15 = vld [vmem:[%s2360_s28 + $0x98] sm:$0xff]  ;;  %v238_v18 = vld [vmem:[%s2360_s28 + $0x48] sm:$0xff] }
  0x15   : > { %v270_v16 = vpack.c.bf16 %v248_v15, %v247_v14  ;;  %v265_v19 = vpack.c.bf16 %v238_v18, %v237_v17  ;;  %v249_v20 = vld [vmem:[%s2360_s28 + $0xa0] sm:$0xff]  ;;  %v250_v21 = vld [vmem:[%s2360_s28 + $0xa8] sm:$0xff]  ;;  %v239_v23 = vld [vmem:[%s2360_s28 + $0x50] sm:$0xff]  ;;  %1929 = vmatpush.bf16.msra.mxu1 %v2210_v56  ;;  %2217 = vmatpush.bf16.msra.mxu2 %v2210_v56 }
  0x16   : > { %v271_v22 = vpack.c.bf16 %v250_v21, %v249_v20  ;;  %v240_v24 = vld [vmem:[%s2360_s28 + $0x58] sm:$0xff]  ;;  %v251_v26 = vld [vmem:[%s2360_s28 + $0xb0] sm:$0xff]  ;;  %v241_v29 = vld [vmem:[%s2360_s28 + $0x60] sm:$0xff] }
  0x17   : > { %2130 = vmatmul.msk.bf16.vlgmr.msra.gmra.mxu3 %vm297_vm0, %v270_v16  ;;  %v266_v25 = vpack.c.bf16 %v240_v24, %v239_v23  ;;  %v252_v27 = vld [vmem:[%s2360_s28 + $0xb8] sm:$0xff]  ;;  %v242_v30 = vld [vmem:[%s2360_s28 + $0x68] sm:$0xff]  ;;  %v253_v32 = vld [vmem:[%s2360_s28 + $0xc0] sm:$0xff] }
  0x18   : > { %v272_v28 = vpack.c.bf16 %v252_v27, %v251_v26  ;;  %v267_v31 = vpack.c.bf16 %v242_v30, %v241_v29  ;;  %v254_v33 = vld [vmem:[%s2360_s28 + $0xc8] sm:$0xff]  ;;  %v243_v35 = vld [vmem:[%s2360_s28 + $0x70] sm:$0xff]  ;;  %v244_v36 = vld [vmem:[%s2360_s28 + $0x78] sm:$0xff] }
  0x19   : > { %v273_v34 = vpack.c.bf16 %v254_v33, %v253_v32  ;;  %v268_v37 = vpack.c.bf16 %v244_v36, %v243_v35  ;;  %v255_v38 = vld [vmem:[%s2360_s28 + $0xd0] sm:$0xff]  ;;  %v256_v39 = vld [vmem:[%s2360_s28 + $0xd8] sm:$0xff]  ;;  %v245_v41 = vld [vmem:[%s2360_s28 + $0x80] sm:$0xff]  ;;  %1930 = vmatpush.bf16.msra.mxu1 %v2209_v62  ;;  %2218 = vmatpush.bf16.msra.mxu2 %v2209_v62 }
  0x1a   : > { %v274_v40 = vpack.c.bf16 %v256_v39, %v255_v38  ;;  %v246_v42 = vld [vmem:[%s2360_s28 + $0x88] sm:$0xff]  ;;  %v257_v50 = vld [vmem:[%s2360_s28 + $0xe0] sm:$0xff]  ;;  %v2208_v5 = vld [vmem:[%s3883_s3 + $0x18] sm:$0xff] }
  0x1b   : > { %v269_v44 = vpack.c.bf16 %v246_v42, %v245_v41  ;;  %v258_v51 = vld [vmem:[%s2360_s28 + $0xe8] sm:$0xff]  ;;  %v2207_v14 = vld [vmem:[%s3883_s3 + $0x10] sm:$0xff]  ;;  %v260_v16 = vld [vmem:[%s2360_s28 + $0xf8] sm:$0xff] }
  0x1c   : > { %v275_v53 = vpack.c.bf16 %v258_v51, %v257_v50  ;;  %v259_v15 = vld [vmem:[%s2360_s28 + $0xf0] sm:$0xff]  ;;  %v2206_v26 = vld [vmem:[%s3883_s3 + $0x8] sm:$0xff]  ;;  %v2205_v36 = vld [vmem:[%s3883_s3] sm:$0xff] }
  0x1d   : > { %1931 = vmatpush.bf16.msra.mxu1 %v2208_v5  ;;  %2219 = vmatpush.bf16.msra.mxu2 %v2208_v5  ;;  %v276_v17 = vpack.c.bf16 %v260_v16, %v259_v15 }
  0x21   : > { %1932 = vmatpush.bf16.msra.mxu1 %v2207_v14  ;;  %2220 = vmatpush.bf16.msra.mxu2 %v2207_v14 }
  0x24   : > { %2122 = vmatmul.msk.bf16.gmra.mxu0 %vm297_vm0, %v262_v7 }
  0x25   : > { %1933 = vmatpush.bf16.msra.mxu1 %v2206_v26  ;;  %2221 = vmatpush.bf16.msra.mxu2 %v2206_v26 }
  0x27   : > { %2131 = vmatmul.msk.bf16.gmra.mxu3 %vm297_vm0, %v271_v22 }
  0x29   : > { %1934 = vmatpush.bf16.msra.mxu1 %v2205_v36  ;;  %2222 = vmatpush.bf16.msra.mxu2 %v2205_v36 }
  0x34   : > { %2123 = vmatmul.msk.bf16.gmra.mxu0 %vm297_vm0, %v263_v10 }
  0x37   : > { %2132 = vmatmul.msk.bf16.gmra.mxu3 %vm297_vm0, %v272_v28 }
  0x44   : > { %2124 = vmatmul.msk.bf16.gmra.mxu0 %vm297_vm0, %v264_v13 }
  0x47   : > { %2133 = vmatmul.msk.bf16.gmra.mxu3 %vm297_vm0, %v273_v34 }
  0x54   : > { %2125 = vmatmul.msk.bf16.gmra.mxu0 %vm297_vm0, %v265_v19 }
  0x57   : > { %2134 = vmatmul.msk.bf16.gmra.mxu3 %vm297_vm0, %v274_v40 }
  0x64   : > { %2126 = vmatmul.msk.bf16.gmra.mxu0 %vm297_vm0, %v266_v25 }
  0x67   : > { %2135 = vmatmul.msk.bf16.gmra.mxu3 %vm297_vm0, %v275_v53 }
  0x74   : > { %2127 = vmatmul.msk.bf16.gmra.mxu0 %vm297_vm0, %v267_v31 }
  0x77   : > { %2136 = vmatmul.msk.bf16.gmra.mxu3 %vm297_vm0, %v276_v17 }
  0x84   : > { %2128 = vmatmul.msk.bf16.gmra.mxu0 %vm297_vm0, %v268_v37 }
  0x91   : > { %v355_v45 = vpop.f32.mrf.mxu0 }
  0x92   : > { %v2412_v47 = vadd.f32 %v2406_v43, %v355_v45 }
  0x94   : > { %v2415_v48 = vmul.f32 0.70710677, %v2412_v47  ;;  %2129 = vmatmul.msk.bf16.gmra.mxu0 %vm297_vm0, %v269_v44 }
  0x96   : > { %v499_v52 = vmul.f32 %v2415_v48, %v2415_v48 }
  0x98   : > { %v2425_v54 = vmin.f32 %v499_v52, 16.0 }
  0x99   : > { %v357_v55 = vpop.f32.mrf.mxu0 }
  0x9a   : > { %v501_v57 = vmul.f32 2.1237322e-06, %v2425_v54  ;;  %v2433_v58 = vadd.f32 %v2406_v43, %v357_v55  ;;  %v512_v59 = vmul.f32 3.8918573e-05, %v2425_v54 }
  0x9c   : > { %v502_v60 = vadd.f32 0.00028619796, %v501_v57  ;;  %v2437_v61 = vmul.f32 0.70710677, %v2433_v58  ;;  %v513_v63 = vadd.f32 0.001143296, %v512_v59 }
  0x9e   : > { %v539_v0 = vmul.f32 %v2437_v61, %v2437_v61  ;;  %v514_v1 = vmul.f32 %v513_v63, %v2425_v54  ;;  %v503_v2 = vmul.f32 %v502_v60, %v2425_v54 }
  0xa0   : > { %v2446_v3 = vmin.f32 %v539_v0, 16.0  ;;  %v515_v6 = vadd.f32 0.014752088, %v514_v1  ;;  %v504_v11 = vadd.f32 0.0036580483, %v503_v2 }
  0xa1   : > { %v360_v4 = vpop.f32.mrf.mxu0 }
  0xa2   : > { %v541_v7 = vmul.f32 2.1237322e-06, %v2446_v3  ;;  %v2453_v8 = vadd.f32 %v2406_v43, %v360_v4  ;;  %v516_v9 = vmul.f32 %v515_v6, %v2425_v54  ;;  %v552_v10 = vmul.f32 3.8918573e-05, %v2446_v3 }
  0xa3   : > { %v505_v22 = vmul.f32 %v504_v11, %v2425_v54 }
  0xa4   : > { %v542_v12 = vadd.f32 0.00028619796, %v541_v7  ;;  %v2458_v13 = vmul.f32 0.70710677, %v2453_v8  ;;  %v517_v18 = vadd.f32 0.112945676, %v516_v9 }
  0xa5   : > { %v553_v21 = vadd.f32 0.001143296, %v552_v10  ;;  %v506_v33 = vadd.f32 0.05243302, %v505_v22 }
  0xa6   : > { %v543_v19 = vmul.f32 %v542_v12, %v2446_v3  ;;  %v579_v20 = vmul.f32 %v2458_v13, %v2458_v13  ;;  %v518_v23 = vmul.f32 %v517_v18, %v2425_v54 }
  0xa7   : > { %v554_v27 = vmul.f32 %v553_v21, %v2446_v3  ;;  %v507_v44 = vmul.f32 %v506_v33, %v2425_v54 }
  0xa8   : > { %v2471_v24 = vmin.f32 %v579_v20, 16.0  ;;  %v519_v29 = vadd.f32 0.4994258, %v518_v23  ;;  %v544_v30 = vadd.f32 0.0036580483, %v543_v19 }
  0xa9   : > { %v362_v25 = vpop.f32.mrf.mxu0  ;;  %v555_v31 = vadd.f32 0.014752088, %v554_v27  ;;  %v508_v55 = vadd.f32 0.18741608, %v507_v44 }
  0xaa   : > { %v2478_v28 = vadd.f32 %v2406_v43, %v362_v25  ;;  %v592_v32 = vmul.f32 3.8918573e-05, %v2471_v24  ;;  %v520_v34 = vmul.f32 %v519_v29, %v2425_v54  ;;  %v545_v40 = vmul.f32 %v544_v30, %v2446_v3 }
  0xab   : > { %v556_v37 = vmul.f32 %v555_v31, %v2446_v3  ;;  %v581_v49 = vmul.f32 2.1237322e-06, %v2471_v24  ;;  %v509_v2 = vmul.f32 %v508_v55, %v2425_v54 }
  0xac   : > { %v2483_v35 = vmul.f32 0.70710677, %v2478_v28  ;;  %v521_v38 = vadd.f32 1.0, %v520_v34  ;;  %v593_v39 = vadd.f32 0.001143296, %v592_v32 }
  0xad   : > { %v557_v42 = vadd.f32 0.112945676, %v556_v37  ;;  %v546_v51 = vadd.f32 0.05243302, %v545_v40  ;;  %v582_v60 = vadd.f32 0.00028619796, %v581_v49 }
  0xae   : > { %v619_v41 = vmul.f32 %v2483_v35, %v2483_v35  ;;  %2233 = vrcp.f32 %v521_v38  ;;  %v594_v50 = vmul.f32 %v593_v39, %v2471_v24  ;;  %v510_v54 = vadd.f32 1.1283791, %v509_v2 }
  0xaf   : > { %v558_v46 = vmul.f32 %v557_v42, %v2446_v3  ;;  %v547_v63 = vmul.f32 %v546_v51, %v2446_v3  ;;  %v583_v9 = vmul.f32 %v582_v60, %v2471_v24  ;;  %v533_v17 = vand.u32 2147483648, %v521_v38 }
  0xb0   : > { %v2496_v52 = vmin.f32 %v619_v41, 16.0  ;;  %v595_v62 = vadd.f32 0.014752088, %v594_v50  ;;  %vm527_vm2 = vweird.f32 %v521_v38  ;;  %v531_v20 = vand.u32 2147483647, %v521_v38 }
  0xb1   : > { %v365_v45 = vpop.f32.mrf.mxu0  ;;  %v559_v53 = vadd.f32 0.4994258, %v558_v46  ;;  %v548_v12 = vadd.f32 0.18741608, %v547_v63  ;;  %v584_v26 = vadd.f32 0.0036580483, %v583_v9  ;;  %v511_v34 = vmul.f32 %v510_v54, %v2415_v48 }
  0xb2   : > { %v2499_v56 = vadd.f32 %v2406_v43, %v365_v45  ;;  %v621_v0 = vmul.f32 2.1237322e-06, %v2496_v52  ;;  %v596_v10 = vmul.f32 %v595_v62, %v2471_v24  ;;  %v632_v11 = vmul.f32 3.8918573e-05, %v2496_v52 }
  0xb3   : > { %v560_v57 = vmul.f32 %v559_v53, %v2446_v3  ;;  %v549_v25 = vmul.f32 %v548_v12, %v2446_v3  ;;  %v534_v32 = vor.u32 1.1754944e-38, %v533_v17  ;;  %vm532_vm4 = vcmp.eq.f32.partialorder %v531_v20, 8.507059e+37 }
  0xb4   : > { %v2234_v59 = vpop.eup %2233  ;;  %v2506_v4 = vmul.f32 0.70710677, %v2499_v56  ;;  %v622_v14 = vadd.f32 0.00028619796, %v621_v0  ;;  %v597_v22 = vadd.f32 0.112945676, %v596_v10  ;;  %v585_v44 = vmul.f32 %v584_v26, %v2471_v24 }
  0xb5   : > { %v523_v1 = vmul.f32 %v2234_v59, %v521_v38  ;;  %v2508_v5 = vadd.f32 1.0, %v560_v57  ;;  %vm528_vm1 = vweird.f32 %v2234_v59  ;;  %v633_v23 = vadd.f32 0.001143296, %v632_v11 }
  0xb6   : > { %v659_v16 = vmul.f32 %v2506_v4, %v2506_v4  ;;  %vm2519_vm3 = vmor %vm527_vm2, %vm528_vm1  ;;  %v623_v27 = vmul.f32 %v622_v14, %v2496_v52  ;;  %v598_v33 = vmul.f32 %v597_v22, %v2471_v24  ;;  %v550_v42 = vadd.f32 1.1283791, %v549_v25 }
  0xb7   : > { %v524_v7 = vsub.f32 1.0, %v523_v1  ;;  %2235 = vrcp.f32 %v2508_v5  ;;  %v634_v41 = vmul.f32 %v633_v23, %v2496_v52  ;;  %v571_v49 = vand.u32 2147483647, %v2508_v5 }
  0xb8   : > { %v2527_v31 = vmin.f32 %v659_v16, 16.0  ;;  %v599_v40 = vadd.f32 0.4994258, %v598_v33  ;;  %v624_v45 = vadd.f32 0.0036580483, %v623_v27  ;;  %v573_v50 = vand.u32 2147483648, %v2508_v5 }
  0xb9   : > { %v367_v6 = vpop.f32.mrf.mxu0  ;;  %v525_v15 = vmul.f32 %v2234_v59, %v524_v7  ;;  %v635_v62 = vadd.f32 0.014752088, %v634_v41  ;;  %v586_v63 = vadd.f32 0.05243302, %v585_v44  ;;  %vm567_vm6 = vweird.f32 %v2508_v5 }
  0xba   : > { %v2517_v18 = vadd.f32 %v2406_v43, %v367_v6  ;;  %v661_v48 = vmul.f32 2.1237322e-06, %v2527_v31  ;;  %v600_v51 = vmul.f32 %v599_v40, %v2471_v24  ;;  %v625_v0 = vmul.f32 %v624_v45, %v2496_v52 }
  0xbb   : > { %v526_v19 = vadd.f32 %v2234_v59, %v525_v15  ;;  %v551_v2 = vmul.f32 %v550_v42, %v2437_v61  ;;  %v574_v7 = vor.u32 1.1754944e-38, %v573_v50  ;;  %vm572_vm8 = vcmp.eq.f32.partialorder %v571_v49, 8.507059e+37 }
  0xbc   : > { %v2532_v36 = vmul.f32 0.70710677, %v2517_v18  ;;  %v2549_v60 = vadd.f32 1.0, %v600_v51  ;;  %v662_v6 = vadd.f32 0.00028619796, %v661_v48  ;;  %v636_v61 = vmul.f32 %v635_v62, %v2496_v52 }
  0xbd   : > { %v530_v29 = vsel %vm2519_vm3, %v2234_v59, %v526_v19  ;;  %v2236_v30 = vpop.eup %2235  ;;  %v587_v54 = vmul.f32 %v586_v63, %v2471_v24  ;;  %v626_v16 = vadd.f32 0.05243302, %v625_v0  ;;  %v435_v19 = vmul.f32 0.5, %v2412_v47 }
  0xbe   : > { %v563_v3 = vmul.f32 %v2236_v30, %v2508_v5  ;;  %v535_v39 = vsel %vm532_vm4, %v534_v32, %v530_v29  ;;  %vm568_vm5 = vweird.f32 %v2236_v30  ;;  %v699_v59 = vmul.f32 %v2532_v36, %v2532_v36 }
  0xbf   : > { %v536_v55 = vmul.f32 %v535_v39, %v511_v34  ;;  %vm569_vm7 = vmor %vm567_vm6, %vm568_vm5  ;;  %2237 = vrcp.f32 %v2549_v60  ;;  %v436_v20 = vmul.f32 0.5, %v2433_v58  ;;  %v663_v21 = vmul.f32 %v662_v6, %v2527_v31 }
  0xc0   : > { %v564_v46 = vsub.f32 1.0, %v563_v3  ;;  %v2557_v14 = vmin.f32 %v699_v59, 16.0  ;;  %v672_v32 = vmul.f32 3.8918573e-05, %v2527_v31  ;;  %v588_v33 = vadd.f32 0.18741608, %v587_v54 }
  0xc1   : > { %v370_v37 = vpop.f32.mrf.mxu0  ;;  %v2137_v11 = vclamps-f32 %v536_v55, 1.0  ;;  %v627_v47 = vmul.f32 %v626_v16, %v2496_v52  ;;  %vm607_vm10 = vweird.f32 %v2549_v60 }
  0xc2   : > { %v2536_v38 = vadd.f32 %v2406_v43, %v370_v37  ;;  %v565_v57 = vmul.f32 %v2236_v30, %v564_v46  ;;  %v701_v29 = vmul.f32 2.1237322e-06, %v2557_v14  ;;  %v664_v37 = vadd.f32 0.0036580483, %v663_v21 }
  0xc3   : > { %v1779_v26 = vadd.f32 1.0, %v2137_v11  ;;  %v673_v40 = vadd.f32 0.001143296, %v672_v32  ;;  %v589_v0 = vmul.f32 %v588_v33, %v2471_v24 }
  0xc4   : > { %v2545_v53 = vmul.f32 0.70710677, %v2536_v38  ;;  %v566_v1 = vadd.f32 %v2236_v30, %v565_v57  ;;  %v702_v48 = vadd.f32 0.00028619796, %v701_v29 }
  0xc5   : > { %v2572_v27 = vpop.eup %2237  ;;  %v1811_v44 = vmul.f32 %v1779_v26, %v435_v19  ;;  %v674_v51 = vmul.f32 %v673_v40, %v2527_v31  ;;  %v611_v19 = vand.u32 2147483647, %v2549_v60 }
  0xc6   : > { %v739_v9 = vmul.f32 %v2545_v53, %v2545_v53  ;;  %v570_v12 = vsel %vm569_vm7, %v2236_v30, %v566_v1  ;;  %v637_v30 = vadd.f32 0.112945676, %v636_v61  ;;  %v603_v34 = vmul.f32 %v2572_v27, %v2549_v60 }
  0xc7   : > { %v575_v5 = vsel %vm572_vm8, %v574_v7, %v570_v12  ;;  %v628_v1 = vadd.f32 0.18741608, %v627_v47  ;;  %v675_v6 = vadd.f32 0.014752088, %v674_v51  ;;  %v665_v7 = vmul.f32 %v664_v37, %v2527_v31 }
  0xc8   : > { %v576_v17 = vmul.f32 %v575_v5, %v551_v2  ;;  %v2567_v22 = vmin.f32 %v739_v9, 16.0  ;;  %v638_v39 = vmul.f32 %v637_v30, %v2496_v52  ;;  %v604_v46 = vsub.f32 1.0, %v603_v34 }
  0xc9   : > { %v372_v10 = vpop.f32.mrf.mxu0  ;;  %v703_v9 = vmul.f32 %v702_v48, %v2557_v14  ;;  %vm608_vm9 = vweird.f32 %v2572_v27  ;;  %v676_v24 = vmul.f32 %v675_v6, %v2527_v31  ;;  %v629_v54 = vmul.f32 %v628_v1, %v2496_v52 }
  0xca   : > { %v2560_v15 = vadd.f32 %v2406_v43, %v372_v10  ;;  %v2138_v25 = vclamps-f32 %v576_v17, 1.0  ;;  %v741_v41 = vmul.f32 2.1237322e-06, %v2567_v22  ;;  %v639_v50 = vadd.f32 0.4994258, %v638_v39  ;;  %vm2614_vm11 = vmor %vm607_vm10, %vm608_vm9 }
  0xcb   : > { %v605_v57 = vmul.f32 %v2572_v27, %v604_v46  ;;  %v613_v10 = vand.u32 2147483648, %v2549_v60  ;;  %v666_v21 = vadd.f32 0.05243302, %v665_v7  ;;  %v677_v29 = vadd.f32 0.112945676, %v676_v24 }
  0xcc   : > { %v2570_v23 = vmul.f32 0.70710677, %v2560_v15  ;;  %v1780_v58 = vadd.f32 1.0, %v2138_v25  ;;  %v640_v63 = vmul.f32 %v639_v50, %v2496_v52  ;;  %v742_v2 = vadd.f32 0.00028619796, %v741_v41 }
  0xcd   : > { %v606_v5 = vadd.f32 %v2572_v27, %v605_v57  ;;  %v704_v30 = vadd.f32 0.0036580483, %v703_v9  ;;  %v614_v33 = vor.u32 1.1754944e-38, %v613_v10  ;;  %v630_v34 = vadd.f32 1.1283791, %v629_v54 }
  0xce   : > { %v779_v3 = vmul.f32 %v2570_v23, %v2570_v23  ;;  %v1812_v45 = vmul.f32 %v1780_v58, %v436_v20  ;;  %v2598_v11 = vadd.f32 1.0, %v640_v63  ;;  %v743_v16 = vmul.f32 %v742_v2, %v2567_v22 }
  0xcf   : > { %v590_v20 = vadd.f32 1.1283791, %v589_v0  ;;  %v610_v52 = vsel %vm2614_vm11, %v2572_v27, %v606_v5  ;;  %v712_v58 = vmul.f32 3.8918573e-05, %v2557_v14  ;;  %vm612_vm12 = vcmp.eq.f32.partialorder %v611_v19, 8.507059e+37 }
  0xd0   : > { %v1843_v55 = vpack.c.bf16 %v1812_v45, %v1811_v44  ;;  %v2588_v59 = vmin.f32 %v779_v3, 16.0  ;;  %2239 = vrcp.f32 %v2598_v11  ;;  %v744_v37 = vadd.f32 0.0036580483, %v743_v16 }
  0xd1   : > { %v375_v42 = vpop.f32.mrf.mxu0  ;;  %v678_v3 = vmul.f32 %v677_v29, %v2527_v31  ;;  %v591_v40 = vmul.f32 %v590_v20, %v2458_v13  ;;  %v615_v41 = vsel %vm612_vm12, %v614_v33, %v610_v52  ;;  %v705_v27 = vmul.f32 %v704_v30, %v2557_v14 }
  0xd2   : > { %v2584_v49 = vadd.f32 %v2406_v43, %v375_v42  ;;  %1935 = vmatmul.bf16.vlgmr.msra.gmra.mxu1 %v1843_v55  ;;  %v781_v61 = vmul.f32 2.1237322e-06, %v2588_v59  ;;  %v667_v42 = vmul.f32 %v666_v21, %v2527_v31  ;;  %v713_v51 = vadd.f32 0.001143296, %v712_v58  ;;  %v400_v21 = vpop.f32.mrf.mxu3 }
  0xd3   : > { %v679_v50 = vadd.f32 0.4994258, %v678_v3  ;;  %v631_v55 = vmul.f32 %v630_v34, %v2483_v35  ;;  %v745_v13 = vmul.f32 %v744_v37, %v2567_v22  ;;  %v616_v63 = vmul.f32 %v615_v41, %v591_v40 }
  0xd4   : > { %v2591_v62 = vmul.f32 0.70710677, %v2584_v49  ;;  %v782_v47 = vadd.f32 0.00028619796, %v781_v61  ;;  %v651_v2 = vand.u32 2147483647, %v2598_v11  ;;  %v714_v61 = vmul.f32 %v713_v51, %v2557_v14 }
  0xd5   : > { %v653_v6 = vand.u32 2147483648, %v2598_v11  ;;  %v680_v7 = vmul.f32 %v679_v50, %v2527_v31  ;;  %v706_v9 = vadd.f32 0.05243302, %v705_v27  ;;  %v746_v54 = vadd.f32 0.05243302, %v745_v13 }
  0xd6   : > { %v819_v12 = vmul.f32 %v2591_v62, %v2591_v62  ;;  %v2240_v39 = vpop.eup %2239  ;;  %v783_v46 = vmul.f32 %v782_v47, %v2588_v59  ;;  %vm647_vm14 = vweird.f32 %v2598_v11  ;;  %v2139_v19 = vclamps-f32 %v616_v63, 1.0 }
  0xd7   : > { %v643_v45 = vmul.f32 %v2240_v39, %v2598_v11  ;;  %vm648_vm13 = vweird.f32 %v2240_v39  ;;  %v2646_v24 = vadd.f32 1.0, %v680_v7  ;;  %vm652_vm0 = vcmp.eq.f32.partialorder %v651_v2, 8.507059e+37 }
  0xd8   : > { %v2618_v32 = vmin.f32 %v819_v12, 16.0  ;;  %v784_v5 = vadd.f32 0.0036580483, %v783_v46  ;;  %vm649_vm15 = vmor %vm647_vm14, %vm648_vm13  ;;  %v654_v20 = vor.u32 1.1754944e-38, %v653_v6  ;;  %v2658_v52 = vadd.f32 %v2406_v43, %v400_v21 }
  0xd9   : > { %v377_v17 = vpop.f32.mrf.mxu0  ;;  %v644_v0 = vsub.f32 1.0, %v643_v45  ;;  %2241 = vrcp.f32 %v2646_v24  ;;  %v715_v58 = vadd.f32 0.014752088, %v714_v61  ;;  %v437_v34 = vmul.f32 0.5, %v2453_v8 }
  0xda   : > { %v2612_v25 = vadd.f32 %v2406_v43, %v377_v17  ;;  %v821_v44 = vmul.f32 2.1237322e-06, %v2618_v32  ;;  %v785_v33 = vmul.f32 %v784_v5, %v2588_v59  ;;  %v2666_v41 = vmul.f32 0.70710677, %v2658_v52 }
  0xdb   : > { %v645_v12 = vmul.f32 %v2240_v39, %v644_v0  ;;  %v668_v27 = vadd.f32 0.18741608, %v667_v42  ;;  %v1781_v50 = vadd.f32 1.0, %v2139_v19  ;;  %v716_v42 = vmul.f32 %v715_v58, %v2557_v14 }
  0xdc   : > { %v2624_v60 = vmul.f32 0.70710677, %v2612_v25  ;;  %v822_v10 = vadd.f32 0.00028619796, %v821_v44  ;;  %v747_v44 = vmul.f32 %v746_v54, %v2567_v22  ;;  %v1219_v8 = vmul.f32 %v2666_v41, %v2666_v41 }
  0xdd   : > { %v646_v17 = vadd.f32 %v2240_v39, %v645_v12  ;;  %v438_v63 = vmul.f32 0.5, %v2478_v28  ;;  %v2681_v0 = vmul.f32 0.5, %v2499_v56  ;;  %v669_v7 = vmul.f32 %v668_v27, %v2527_v31 }
  0xde   : > { %v859_v48 = vmul.f32 %v2624_v60, %v2624_v60  ;;  %v823_v26 = vmul.f32 %v822_v10, %v2618_v32  ;;  %v748_v10 = vadd.f32 0.18741608, %v747_v44  ;;  %v1813_v61 = vmul.f32 %v1781_v50, %v437_v34 }
  0xdf   : > { %v650_v30 = vsel %vm649_vm15, %v2240_v39, %v646_v17  ;;  %v707_v39 = vmul.f32 %v706_v9, %v2557_v14  ;;  %v2675_v51 = vpop.eup %2241  ;;  %v2690_v17 = vmin.f32 %v1219_v8, 16.0  ;;  %v2703_v34 = vmul.f32 0.5, %v2517_v18 }
  0xe0   : > { %v2644_v35 = vmin.f32 %v859_v48, 16.0  ;;  %v655_v47 = vsel %vm652_vm0, %v654_v20, %v650_v30  ;;  %v824_v46 = vadd.f32 0.0036580483, %v823_v26  ;;  %v683_v12 = vmul.f32 %v2675_v51, %v2646_v24 }
  0xe1   : > { %v380_v57 = vpop.f32.mrf.mxu0  ;;  %v656_v3 = vmul.f32 %v655_v47, %v631_v55  ;;  %v786_v55 = vadd.f32 0.05243302, %v785_v33  ;;  %v708_v9 = vadd.f32 0.18741608, %v707_v39  ;;  %3895 = vst [vmem:[#allocation2_spill] sm:$0xff] %v2690_v17  ;;  %v2712_v50 = vmul.f32 0.5, %v2536_v38 }
  0xe2   : > { %v2639_v1 = vadd.f32 %v2406_v43, %v380_v57  ;;  %v861_v11 = vmul.f32 2.1237322e-06, %v2644_v35  ;;  %v825_v5 = vmul.f32 %v824_v46, %v2618_v32  ;;  %v717_v20 = vadd.f32 0.112945676, %v716_v42 }
  0xe3   : > { %v2140_v48 = vclamps-f32 %v656_v3, 1.0  ;;  %v787_v28 = vmul.f32 %v786_v55, %v2588_v59  ;;  %v1221_v26 = vmul.f32 2.1237322e-06, %v2690_v17  ;;  %v752_v30 = vmul.f32 3.8918573e-05, %v2567_v22 }
  0xe4   : > { %v2650_v16 = vmul.f32 0.70710677, %v2639_v1  ;;  %v862_v13 = vadd.f32 0.00028619796, %v861_v11  ;;  %v670_v33 = vadd.f32 1.1283791, %v669_v7  ;;  %v718_v58 = vmul.f32 %v717_v20, %v2557_v14 }
  0xe5   : > { %v1782_v2 = vadd.f32 1.0, %v2140_v48  ;;  %v684_v47 = vsub.f32 1.0, %v683_v12  ;;  %v709_v3 = vmul.f32 %v708_v9, %v2557_v14  ;;  %v826_v27 = vadd.f32 0.05243302, %v825_v5 }
  0xe6   : > { %v899_v29 = vmul.f32 %v2650_v16, %v2650_v16  ;;  %v863_v56 = vmul.f32 %v862_v13, %v2644_v35  ;;  %v788_v39 = vadd.f32 0.18741608, %v787_v28  ;;  %v1222_v18 = vadd.f32 0.00028619796, %v1221_v26 }
  0xe7   : > { %v1814_v54 = vmul.f32 %v1782_v2, %v438_v63  ;;  %v753_v55 = vadd.f32 0.001143296, %v752_v30  ;;  %v2717_v13 = vmul.f32 %v670_v33, %v2506_v4  ;;  %v685_v42 = vmul.f32 %v2675_v51, %v684_v47 }
  0xe8   : > { %v2663_v37 = vmin.f32 %v899_v29, 16.0  ;;  %v864_v44 = vadd.f32 0.0036580483, %v863_v56  ;;  %v719_v63 = vadd.f32 0.4994258, %v718_v58  ;;  %v2724_v9 = vmul.f32 0.5, %v2584_v49 }
  0xe9   : > { %v382_v40 = vpop.f32.mrf.mxu0  ;;  %v1844_v21 = vpack.c.bf16 %v1814_v54, %v1813_v61  ;;  %v710_v2 = vadd.f32 1.1283791, %v709_v3  ;;  %v827_v38 = vmul.f32 %v826_v27, %v2618_v32  ;;  %v789_v61 = vmul.f32 %v788_v39, %v2588_v59 }
  0xea   : > { %v2671_v45 = vadd.f32 %v2406_v43, %v382_v40  ;;  %v901_v57 = vmul.f32 2.1237322e-06, %v2663_v37  ;;  %v749_v40 = vmul.f32 %v748_v10, %v2567_v22  ;;  %v402_v10 = vpop.f32.mrf.mxu3  ;;  %v865_v12 = vmul.f32 %v864_v44, %v2644_v35 }
  0xeb   : > { %1940 = vmatmul.bf16.gmra.mxu1 %v1844_v21  ;;  %v1223_v28 = vmul.f32 %v1222_v18, %v2690_v17  ;;  %v754_v49 = vmul.f32 %v753_v55, %v2567_v22  ;;  %v686_v56 = vadd.f32 %v2675_v51, %v685_v42  ;;  %vm688_vm1 = vweird.f32 %v2675_v51 }
  0xec   : > { %v2684_v6 = vmul.f32 0.70710677, %v2671_v45  ;;  %v902_v19 = vadd.f32 0.00028619796, %v901_v57  ;;  %v2720_v57 = vmul.f32 0.5, %v2560_v15  ;;  %v720_v15 = vmul.f32 %v719_v63, %v2557_v14 }
  0xed   : > { %v750_v7 = vadd.f32 1.1283791, %v749_v40  ;;  %v2740_v20 = vadd.f32 %v2406_v43, %v402_v10  ;;  %vm687_vm2 = vweird.f32 %v2646_v24  ;;  %v691_v14 = vand.u32 2147483647, %v2646_v24 }
  0xee   : > { %v939_v31 = vmul.f32 %v2684_v6, %v2684_v6  ;;  %v903_v46 = vmul.f32 %v902_v19, %v2663_v37  ;;  %v2737_v19 = vadd.f32 1.0, %v720_v15  ;;  %v693_v26 = vand.u32 2147483648, %v2646_v24  ;;  %vm2757_vm3 = vmor %vm687_vm2, %vm688_vm1 }
  0xef   : > { %v2750_v47 = vmul.f32 %v710_v2, %v2532_v36  ;;  %v2753_v58 = vmul.f32 0.5, %v2612_v25  ;;  %v1224_v40 = vadd.f32 0.0036580483, %v1223_v28  ;;  %v2762_v24 = vmul.f32 %v750_v7, %v2545_v53 }
  0xf0   : > { %v2714_v8 = vmin.f32 %v939_v31, 16.0  ;;  %v904_v5 = vadd.f32 0.0036580483, %v903_v46  ;;  %v828_v31 = vadd.f32 0.18741608, %v827_v38  ;;  %2243 = vrcp.f32 %v2737_v19 }
  0xf1   : > { %v385_v29 = vpop.f32.mrf.mxu0  ;;  %v790_v39 = vadd.f32 1.1283791, %v789_v61  ;;  %v690_v36 = vsel %vm2757_vm3, %v2675_v51, %v686_v56  ;;  %v2768_v44 = vmul.f32 0.70710677, %v2740_v20  ;;  %vm692_vm4 = vcmp.eq.f32.partialorder %v691_v14, 8.507059e+37 }
  0xf2   : > { %v2699_v11 = vadd.f32 %v2406_v43, %v385_v29  ;;  %v941_v54 = vmul.f32 2.1237322e-06, %v2714_v8  ;;  %v866_v29 = vadd.f32 0.05243302, %v865_v12  ;;  %v905_v30 = vmul.f32 %v904_v5, %v2663_v37 }
  0xf3   : > { %v829_v25 = vmul.f32 %v828_v31, %v2618_v32  ;;  %v694_v46 = vor.u32 1.1754944e-38, %v693_v26  ;;  %v755_v18 = vadd.f32 0.014752088, %v754_v49  ;;  %v2777_v2 = vmul.f32 0.5, %v2639_v1 }
  0xf4   : > { %v2709_v48 = vmul.f32 0.70710677, %v2699_v11  ;;  %v942_v3 = vadd.f32 0.00028619796, %v941_v54  ;;  %v867_v55 = vmul.f32 %v866_v29, %v2644_v35  ;;  %v906_v42 = vadd.f32 0.05243302, %v905_v30 }
  0xf5   : > { %v1225_v7 = vmul.f32 %v1224_v40, %v2690_v17  ;;  %v695_v38 = vsel %vm692_vm4, %v694_v46, %v690_v36  ;;  %v2782_v12 = vmul.f32 %v790_v39, %v2570_v23  ;;  %v2785_v5 = vmul.f32 0.5, %v2658_v52 }
  0xf6   : > { %v979_v4 = vmul.f32 %v2709_v48, %v2709_v48  ;;  %v943_v51 = vmul.f32 %v942_v3, %v2714_v8  ;;  %v2244_v10 = vpop.eup %2243  ;;  %v2792_v1 = vadd.f32 1.1283791, %v829_v25  ;;  %v2795_v61 = vmul.f32 0.5, %v2671_v45 }
  0xf7   : > { %3898 = vst [vmem:[#allocation3_spill] sm:$0xff] %v2785_v5  ;;  %v723_v54 = vmul.f32 %v2244_v10, %v2737_v19  ;;  %v756_v28 = vmul.f32 %v755_v18, %v2567_v22  ;;  %v868_v23 = vadd.f32 0.18741608, %v867_v55  ;;  %v907_v49 = vmul.f32 %v906_v42, %v2663_v37 }
  0xf8   : > { %v2746_v33 = vmin.f32 %v979_v4, 16.0  ;;  %v1259_v4 = vmul.f32 %v2768_v44, %v2768_v44  ;;  %v696_v56 = vmul.f32 %v695_v38, %v2717_v13  ;;  %v944_v14 = vadd.f32 0.0036580483, %v943_v51 }
  0xf9   : > { %v387_v21 = vpop.f32.mrf.mxu0  ;;  %v1226_v26 = vadd.f32 0.05243302, %v1225_v7  ;;  %v724_v29 = vsub.f32 1.0, %v723_v54  ;;  %v731_v45 = vand.u32 2147483647, %v2737_v19  ;;  %v733_v3 = vand.u32 2147483648, %v2737_v19 }
  0xfa   : > { %v981_v63 = vmul.f32 2.1237322e-06, %v2746_v33  ;;  %v2774_v53 = vadd.f32 %v2406_v43, %v387_v21  ;;  %v405_v21 = vpop.f32.mrf.mxu3  ;;  %v2806_v40 = vmin.f32 %v1259_v4, 16.0  ;;  %vm728_vm5 = vweird.f32 %v2244_v10 }
  0xfb   : > { %v2802_v30 = vadd.f32 %v2406_v43, %v405_v21  ;;  %v725_v39 = vmul.f32 %v2244_v10, %v724_v29  ;;  %v757_v36 = vadd.f32 0.112945676, %v756_v28  ;;  %v2141_v46 = vclamps-f32 %v696_v56, 1.0 }
  0xfc   : > { %v2790_v15 = vmul.f32 0.70710677, %v2774_v53  ;;  %v982_v52 = vadd.f32 0.00028619796, %v981_v63  ;;  %vm727_vm6 = vweird.f32 %v2737_v19  ;;  %v1261_v18 = vmul.f32 2.1237322e-06, %v2806_v40 }
  0xfd   : > { %v726_v55 = vadd.f32 %v2244_v10, %v725_v39  ;;  %v2817_v42 = vmul.f32 0.70710677, %v2802_v30  ;;  %v758_v63 = vmul.f32 %v757_v36, %v2567_v22  ;;  %v792_v51 = vmul.f32 3.8918573e-05, %v2588_v59  ;;  %vm729_vm7 = vmor %vm727_vm6, %vm728_vm5 }
  0xfe   : > { %v1019_v27 = vmul.f32 %v2790_v15, %v2790_v15  ;;  %v983_v25 = vmul.f32 %v982_v52, %v2746_v33  ;;  %v945_v7 = vmul.f32 %v944_v14, %v2714_v8  ;;  %vm732_vm8 = vcmp.eq.f32.partialorder %v731_v45, 8.507059e+37 }
  0xff   : > { %v730_v4 = vsel %vm729_vm7, %v2244_v10, %v726_v55  ;;  %v759_v54 = vadd.f32 0.4994258, %v758_v63  ;;  %v793_v28 = vadd.f32 0.001143296, %v792_v51  ;;  %v908_v52 = vadd.f32 0.18741608, %v907_v49 }
 0x100   : > { %v2822_v38 = vmin.f32 %v1019_v27, 16.0  ;;  %v1227_v56 = vmul.f32 %v1226_v26, %v2690_v17  ;;  %v984_v21 = vadd.f32 0.0036580483, %v983_v25  ;;  %v1262_v39 = vadd.f32 0.00028619796, %v1261_v18 }
 0x101   : > { %v390_v31 = vpop.f32.mrf.mxu0  ;;  %v1299_v14 = vmul.f32 %v2817_v42, %v2817_v42  ;;  %v760_v45 = vmul.f32 %v759_v54, %v2567_v22  ;;  %v869_v10 = vmul.f32 %v868_v23, %v2644_v35  ;;  %v794_v36 = vmul.f32 %v793_v28, %v2588_v59 }
 0x102   : > { %v2811_v13 = vadd.f32 %v2406_v43, %v390_v31  ;;  %v734_v43 = vor.u32 1.1754944e-38, %v733_v3  ;;  %v946_v3 = vadd.f32 0.05243302, %v945_v7  ;;  %v1021_v27 = vmul.f32 2.1237322e-06, %v2822_v38 }
 0x103   : > { %v1783_v55 = vadd.f32 1.0, %v2141_v46  ;;  %v2837_v25 = vadd.f32 1.0, %v760_v45  ;;  %v1228_v18 = vadd.f32 0.18741608, %v1227_v56  ;;  %v985_v63 = vmul.f32 %v984_v21, %v2746_v33 }
 0x104   : > { %v2825_v19 = vmul.f32 0.70710677, %v2811_v13  ;;  %v735_v31 = vsel %vm732_vm8, %v734_v43, %v730_v4  ;;  %v795_v22 = vadd.f32 0.014752088, %v794_v36  ;;  %v1263_v23 = vmul.f32 %v1262_v39, %v2806_v40 }
 0x105   : > { %v736_v29 = vmul.f32 %v735_v31, %v2750_v47  ;;  %v909_v47 = vmul.f32 %v908_v52, %v2663_v37  ;;  %v2842_v7 = vmin.f32 %v1299_v14, 16.0  ;;  %2245 = vrcp.f32 %v2837_v25 }
 0x106   : > { %v1059_v26 = vmul.f32 %v2825_v19, %v2825_v19  ;;  %v870_v43 = vadd.f32 1.1283791, %v869_v10  ;;  %v947_v46 = vmul.f32 %v946_v3, %v2714_v8  ;;  %v1022_v4 = vadd.f32 0.00028619796, %v1021_v27 }
 0x107   : > { %v2142_v49 = vclamps-f32 %v736_v29, 1.0  ;;  %v832_v54 = vmul.f32 3.8918573e-05, %v2618_v32  ;;  %v1815_v28 = vmul.f32 %v1783_v55, %v2681_v0  ;;  %v1301_v56 = vmul.f32 2.1237322e-06, %v2842_v7 }
 0x108   : > { %v2850_v21 = vmin.f32 %v1059_v26, 16.0  ;;  %v2854_v31 = vmul.f32 %v2792_v1, %v2591_v62  ;;  %v1229_v29 = vmul.f32 %v1228_v18, %v2690_v17  ;;  %v2858_v39 = vmul.f32 0.5, %v2699_v11 }
 0x109   : > { %v1784_v51 = vadd.f32 1.0, %v2142_v49  ;;  %v796_v14 = vmul.f32 %v795_v22, %v2588_v59  ;;  %v910_v45 = vadd.f32 1.1283791, %v909_v47  ;;  %v986_v10 = vadd.f32 0.05243302, %v985_v63 }
 0x10a   : > { %3899 = vst [vmem:[#allocation4_spill] sm:$0xff] %v2858_v39  ;;  %v1264_v3 = vadd.f32 0.0036580483, %v1263_v23  ;;  %v1023_v27 = vmul.f32 %v1022_v4, %v2822_v38  ;;  %v833_v49 = vadd.f32 0.001143296, %v832_v54  ;;  %v2865_v62 = vmul.f32 %v870_v43, %v2624_v60 }
 0x10b   : > { %v1816_v52 = vmul.f32 %v1784_v51, %v2703_v34  ;;  %v948_v34 = vadd.f32 0.18741608, %v947_v46  ;;  %v797_v36 = vadd.f32 0.112945676, %v796_v14  ;;  %v2862_v55 = vpop.eup %2245  ;;  %v1302_v1 = vadd.f32 0.00028619796, %v1301_v56  ;;  %v407_v56 = vpop.f32.mrf.mxu3 }
 0x10c   : > { %v1061_v11 = vmul.f32 2.1237322e-06, %v2850_v21  ;;  %v872_v26 = vmul.f32 3.8918573e-05, %v2644_v35  ;;  %v1230_v47 = vadd.f32 1.1283791, %v1229_v29  ;;  %v763_v63 = vmul.f32 %v2862_v55, %v2837_v25  ;;  %v392_v29 = vpop.f32.mrf.mxu0 }
 0x10d   : > { %v1845_v0 = vpack.c.bf16 %v1816_v52, %v1815_v28  ;;  %v2870_v18 = vmul.f32 0.5, %v2740_v20  ;;  %v798_v22 = vmul.f32 %v797_v36, %v2588_v59  ;;  %v2876_v51 = vmul.f32 %v910_v45, %v2650_v16 }
 0x10e   : > { %v987_v60 = vmul.f32 %v986_v10, %v2746_v33  ;;  %v1265_v23 = vmul.f32 %v1264_v3, %v2806_v40  ;;  %v834_v43 = vmul.f32 %v833_v49, %v2618_v32  ;;  %v949_v46 = vmul.f32 %v948_v34, %v2714_v8  ;;  %v2897_v49 = vld [vmem:[%s3882_s2] ss:$0 sm:$0xff] }
 0x10f   : > { %1945 = vmatmul.bf16.gmra.mxu1 %v1845_v0  ;;  %3900 = vst [vmem:[#allocation5_spill] sm:$0xff] %v2870_v18  ;;  %v1024_v4 = vadd.f32 0.0036580483, %v1023_v27  ;;  %v764_v54 = vsub.f32 1.0, %v763_v63  ;;  %v799_v20 = vadd.f32 0.4994258, %v798_v22  ;;  %v1303_v28 = vmul.f32 %v1302_v1, %v2842_v7 }
 0x110   : > { %v1062_v52 = vadd.f32 0.00028619796, %v1061_v11  ;;  %v835_v14 = vadd.f32 0.014752088, %v834_v43  ;;  %v873_v0 = vadd.f32 0.001143296, %v872_v26  ;;  %v2884_v16 = vmul.f32 %v1230_v47, %v2666_v41 }
 0x111   : > { %v2887_v45 = vmul.f32 0.5, %v2774_v53  ;;  %v765_v10 = vmul.f32 %v2862_v55, %v764_v54  ;;  %v800_v3 = vmul.f32 %v799_v20, %v2588_v59  ;;  %v988_v34 = vadd.f32 0.18741608, %v987_v60 }
 0x112   : > { %3901 = vst [vmem:[#allocation6_spill] sm:$0xff] %v2884_v16  ;;  %v1266_v27 = vadd.f32 0.05243302, %v1265_v23  ;;  %v2892_v36 = vmul.f32 0.5, %v2802_v30  ;;  %v2900_v41 = vadd.f32 %v2897_v49, %v392_v29  ;;  %v2902_v1 = vadd.f32 1.1283791, %v949_v46 }
 0x113   : > { %3902 = vst [vmem:[#allocation7_spill] sm:$0xff] %v2887_v45  ;;  %v2904_v53 = vadd.f32 1.0, %v800_v3  ;;  %v2907_v11 = vadd.f32 %v2897_v49, %v407_v56  ;;  %v836_v59 = vmul.f32 %v835_v14, %v2618_v32  ;;  %v1025_v30 = vmul.f32 %v1024_v4, %v2822_v38 }
 0x114   : > { %3903 = vst [vmem:[#allocation8_spill] sm:$0xff] %v2892_v36  ;;  %v1304_v26 = vadd.f32 0.0036580483, %v1303_v28  ;;  %v1063_v47 = vmul.f32 %v1062_v52, %v2850_v21  ;;  %v874_v63 = vmul.f32 %v873_v0, %v2644_v35  ;;  %v766_v22 = vadd.f32 %v2862_v55, %v765_v10  ;;  %v410_v0 = vpop.f32.mrf.mxu3 }
 0x115   : > { %vm768_vm9 = vweird.f32 %v2862_v55  ;;  %2247 = vrcp.f32 %v2904_v53  ;;  %v2917_v60 = vmul.f32 0.70710677, %v2900_v41  ;;  %v989_v23 = vmul.f32 %v988_v34, %v2746_v33 }
 0x116   : > { %v1267_v43 = vmul.f32 %v1266_v27, %v2806_v40  ;;  %v773_v46 = vand.u32 2147483648, %v2837_v25  ;;  %v912_v4 = vmul.f32 3.8918573e-05, %v2663_v37  ;;  %vm767_vm10 = vweird.f32 %v2837_v25 }
 0x117   : > { %v771_v54 = vand.u32 2147483647, %v2837_v25  ;;  %v2926_v20 = vmul.f32 0.70710677, %v2907_v11  ;;  %v837_v28 = vadd.f32 0.112945676, %v836_v59  ;;  %v1305_v56 = vmul.f32 %v1304_v26, %v2842_v7  ;;  %vm2932_vm11 = vmor %vm767_vm10, %vm768_vm9 }
 0x118   : > { %v1026_v52 = vadd.f32 0.05243302, %v1025_v30  ;;  %v2930_v29 = vmul.f32 0.5, %v2811_v13  ;;  %v875_v10 = vadd.f32 0.014752088, %v874_v63  ;;  %v770_v25 = vsel %vm2932_vm11, %v2862_v55, %v766_v22  ;;  %v395_v13 = vpop.f32.mrf.mxu0 }
 0x119   : > { %v1064_v3 = vadd.f32 0.0036580483, %v1063_v47  ;;  %v1099_v34 = vmul.f32 %v2917_v60, %v2917_v60  ;;  %v2942_v27 = vadd.f32 %v2897_v49, %v410_v0  ;;  %v774_v59 = vor.u32 1.1754944e-38, %v773_v46 }
 0x11a   : > { %3904 = vst [vmem:[#allocation9_spill] sm:$0xff] %v2930_v29  ;;  %v838_v30 = vmul.f32 %v837_v28, %v2618_v32  ;;  %v876_v26 = vmul.f32 %v875_v10, %v2644_v35  ;;  %v913_v36 = vadd.f32 0.001143296, %v912_v4  ;;  %v990_v63 = vadd.f32 1.1283791, %v989_v23 }
 0x11b   : > { %v2248_v18 = vpop.eup %2247  ;;  %v1268_v47 = vadd.f32 0.18741608, %v1267_v43  ;;  %vm772_vm12 = vcmp.eq.f32.partialorder %v771_v54, 8.507059e+37  ;;  %v1339_v55 = vmul.f32 %v2926_v20, %v2926_v20  ;;  %v1027_v22 = vmul.f32 %v1026_v52, %v2822_v38 }
 0x11c   : > { %v1306_v14 = vadd.f32 0.05243302, %v1305_v56  ;;  %v775_v5 = vsel %vm772_vm12, %v774_v59, %v770_v25  ;;  %v803_v0 = vmul.f32 %v2248_v18, %v2904_v53  ;;  %v1065_v46 = vmul.f32 %v1064_v3, %v2850_v21 }
 0x11d   : > { %v2951_v16 = vmin.f32 %v1099_v34, 16.0  ;;  %v2954_v28 = vmul.f32 0.70710677, %v2942_v27  ;;  %v2957_v23 = vadd.f32 %v2897_v49, %v395_v13  ;;  %v839_v4 = vadd.f32 0.4994258, %v838_v30 }
 0x11e   : > { %v804_v43 = vsub.f32 1.0, %v803_v0  ;;  %v877_v54 = vadd.f32 0.112945676, %v876_v26  ;;  %v914_v10 = vmul.f32 %v913_v36, %v2663_v37  ;;  %v776_v52 = vmul.f32 %v775_v5, %v2762_v24 }
 0x11f   : > { %3907 = vst [vmem:[#allocation10_spill] sm:$0xff] %v2954_v28  ;;  %v811_v56 = vand.u32 2147483647, %v2904_v53  ;;  %v813_v25 = vand.u32 2147483648, %v2904_v53  ;;  %v2963_v3 = vmin.f32 %v1339_v55, 16.0  ;;  %vm808_vm13 = vweird.f32 %v2248_v18 }
 0x120   : > { %v805_v34 = vmul.f32 %v2248_v18, %v804_v43  ;;  %v840_v59 = vmul.f32 %v839_v4, %v2618_v32  ;;  %v878_v13 = vmul.f32 %v877_v54, %v2644_v35  ;;  %vm807_vm14 = vweird.f32 %v2904_v53 }
 0x121   : > { %v1341_v30 = vmul.f32 2.1237322e-06, %v2963_v3  ;;  %v1101_v36 = vmul.f32 2.1237322e-06, %v2951_v16  ;;  %v1379_v24 = vmul.f32 %v2954_v28, %v2954_v28  ;;  %v2973_v26 = vmul.f32 0.70710677, %v2957_v23  ;;  %vm809_vm15 = vmor %vm807_vm14, %vm808_vm13 }
 0x122   : > { %v806_v5 = vadd.f32 %v2248_v18, %v805_v34  ;;  %v2975_v55 = vadd.f32 1.0, %v840_v59  ;;  %v915_v0 = vadd.f32 0.014752088, %v914_v10  ;;  %v1028_v43 = vadd.f32 0.18741608, %v1027_v22 }
 0x123   : > { %v2143_v32 = vclamps-f32 %v776_v52, 1.0  ;;  %v814_v4 = vor.u32 1.1754944e-38, %v813_v25  ;;  %v879_v54 = vadd.f32 0.4994258, %v878_v13  ;;  %v1269_v53 = vmul.f32 %v1268_v47, %v2806_v40 }
 0x124   : > { %v810_v29 = vsel %vm809_vm15, %v2248_v18, %v806_v5  ;;  %vm812_vm0 = vcmp.eq.f32.partialorder %v811_v56, 8.507059e+37  ;;  %2249 = vrcp.f32 %v2975_v55  ;;  %v1307_v39 = vmul.f32 %v1306_v14, %v2842_v7 }
 0x125   : > { %v815_v34 = vsel %vm812_vm0, %v814_v4, %v810_v29  ;;  %v1342_v45 = vadd.f32 0.00028619796, %v1341_v30  ;;  %v1102_v17 = vadd.f32 0.00028619796, %v1101_v36  ;;  %v2981_v28 = vmin.f32 %v1379_v24, 16.0 }
 0x126   : > { %v816_v59 = vmul.f32 %v815_v34, %v2782_v12  ;;  %v1139_v22 = vmul.f32 %v2973_v26, %v2973_v26  ;;  %v916_v10 = vmul.f32 %v915_v0, %v2663_v37  ;;  %v1029_v47 = vmul.f32 %v1028_v43, %v2822_v38 }
 0x127   : > { %v1066_v18 = vadd.f32 0.05243302, %v1065_v46  ;;  %v1785_v52 = vadd.f32 1.0, %v2143_v32  ;;  %v880_v56 = vmul.f32 %v879_v54, %v2644_v35  ;;  %v2990_v29 = vmul.f32 %v2902_v1, %v2684_v6  ;;  %v412_v46 = vpop.f32.mrf.mxu3 }
 0x128   : > { %v2993_v14 = vmul.f32 %v990_v63, %v2709_v48  ;;  %v2144_v12 = vclamps-f32 %v816_v59, 1.0  ;;  %v1381_v25 = vmul.f32 2.1237322e-06, %v2981_v28  ;;  %v1308_v13 = vadd.f32 0.18741608, %v1307_v39 }
 0x129   : > { %v1343_v30 = vmul.f32 %v1342_v45, %v2963_v3  ;;  %v1103_v36 = vmul.f32 %v1102_v17, %v2951_v16  ;;  %v2998_v24 = vadd.f32 1.0, %v880_v56  ;;  %v1270_v35 = vadd.f32 1.1283791, %v1269_v53 }
 0x12a   : > { %v2250_v5 = vpop.eup %2249  ;;  %v1786_v0 = vadd.f32 1.0, %v2144_v12  ;;  %v3000_v43 = vmin.f32 %v1139_v22, 16.0  ;;  %v917_v6 = vadd.f32 0.112945676, %v916_v10  ;;  %v1030_v1 = vadd.f32 1.1283791, %v1029_v47 }
 0x12b   : > { %v1067_v48 = vmul.f32 %v1066_v18, %v2850_v21  ;;  %v1817_v63 = vmul.f32 %v1785_v52, %v2712_v50  ;;  %v843_v39 = vmul.f32 %v2250_v5, %v2975_v55  ;;  %v1382_v32 = vadd.f32 0.00028619796, %v1381_v25 }
 0x12c   : > { %v1818_v45 = vmul.f32 %v1786_v0, %v2720_v57  ;;  %2251 = vrcp.f32 %v2998_v24  ;;  %v3008_v17 = vadd.f32 %v2897_v49, %v412_v46  ;;  %v1309_v4 = vmul.f32 %v1308_v13, %v2842_v7 }
 0x12d   : > { %v1344_v54 = vadd.f32 0.0036580483, %v1343_v30  ;;  %v1104_v53 = vadd.f32 0.0036580483, %v1103_v36  ;;  %v844_v34 = vsub.f32 1.0, %v843_v39  ;;  %v853_v50 = vand.u32 2147483648, %v2975_v55 }
 0x12e   : > { %v1846_v59 = vpack.c.bf16 %v1818_v45, %v1817_v63  ;;  %v1141_v22 = vmul.f32 2.1237322e-06, %v3000_v43  ;;  %v918_v10 = vmul.f32 %v917_v6, %v2663_v37  ;;  %v1068_v47 = vadd.f32 0.18741608, %v1067_v48  ;;  %v397_v63 = vpop.f32.mrf.mxu0 }
 0x12f   : > { %v845_v57 = vmul.f32 %v2250_v5, %v844_v34  ;;  %vm848_vm1 = vweird.f32 %v2250_v5  ;;  %v851_v18 = vand.u32 2147483647, %v2975_v55  ;;  %v3016_v52 = vmul.f32 %v1270_v35, %v2768_v44 }
 0x130   : > { %v3019_v56 = vmul.f32 %v1030_v1, %v2790_v15  ;;  %1950 = vmatmul.bf16.gmra.mxu1 %v1846_v59  ;;  %v1383_v12 = vmul.f32 %v1382_v32, %v2981_v28  ;;  %v3023_v25 = vmul.f32 0.70710677, %v3008_v17  ;;  %v1310_v13 = vadd.f32 1.1283791, %v1309_v4 }
 0x131   : > { %3908 = vst [vmem:[#allocation11_spill] sm:$0xff] %v3016_v52  ;;  %v1345_v30 = vmul.f32 %v1344_v54, %v2963_v3  ;;  %v846_v36 = vadd.f32 %v2250_v5, %v845_v57  ;;  %vm847_vm2 = vweird.f32 %v2975_v55  ;;  %v1105_v0 = vmul.f32 %v1104_v53, %v2951_v16 }
 0x132   : > { %v2252_v46 = vpop.eup %2251  ;;  %v1142_v44 = vadd.f32 0.00028619796, %v1141_v22  ;;  %vm849_vm3 = vmor %vm847_vm2, %vm848_vm1  ;;  %v854_v35 = vor.u32 1.1754944e-38, %v853_v50  ;;  %v919_v15 = vadd.f32 0.4994258, %v918_v10  ;;  %v1069_v6 = vmul.f32 %v1068_v47, %v2850_v21 }
 0x133   : > { %v850_v1 = vsel %vm849_vm3, %v2250_v5, %v846_v36  ;;  %vm852_vm4 = vcmp.eq.f32.partialorder %v851_v18, 8.507059e+37  ;;  %v883_v48 = vmul.f32 %v2252_v46, %v2998_v24  ;;  %v3031_v39 = vmul.f32 0.5, %v2907_v11  ;;  %v415_v18 = vpop.f32.mrf.mxu3 }
 0x134   : > { %v1384_v45 = vadd.f32 0.0036580483, %v1383_v12  ;;  %v855_v32 = vsel %vm852_vm4, %v854_v35, %v850_v1  ;;  %v1419_v55 = vmul.f32 %v3023_v25, %v3023_v25  ;;  %v3036_v4 = vmul.f32 %v1310_v13, %v2817_v42 }
 0x135   : > { %3909 = vst [vmem:[#allocation12_spill] sm:$0xff] %v3031_v39  ;;  %v1346_v54 = vadd.f32 0.05243302, %v1345_v30  ;;  %v884_v53 = vsub.f32 1.0, %v883_v48  ;;  %v893_v34 = vand.u32 2147483648, %v2998_v24  ;;  %v1143_v59 = vmul.f32 %v1142_v44, %v3000_v43 }
 0x136   : > { %3910 = vst [vmem:[#allocation13_spill] sm:$0xff] %v3036_v4  ;;  %v1106_v5 = vadd.f32 0.05243302, %v1105_v0  ;;  %v3041_v22 = vadd.f32 %v2897_v49, %v397_v63  ;;  %v920_v11 = vmul.f32 %v919_v15, %v2663_v37  ;;  %v856_v50 = vmul.f32 %v855_v32, %v2854_v31 }
 0x137   : > { %v885_v10 = vmul.f32 %v2252_v46, %v884_v53  ;;  %vm888_vm5 = vweird.f32 %v2252_v46  ;;  %v891_v47 = vand.u32 2147483647, %v2998_v24  ;;  %v1385_v42 = vmul.f32 %v1384_v45, %v2981_v28 }
 0x138   : > { %vm887_vm6 = vweird.f32 %v2998_v24  ;;  %v3048_v57 = vmin.f32 %v1419_v55, 16.0  ;;  %v3050_v12 = vadd.f32 1.0, %v920_v11  ;;  %v894_v30 = vor.u32 1.1754944e-38, %v893_v34 }
 0x139   : > { %v886_v13 = vadd.f32 %v2252_v46, %v885_v10  ;;  %v3053_v36 = vadd.f32 %v2897_v49, %v415_v18  ;;  %v952_v37 = vmul.f32 3.8918573e-05, %v2714_v8  ;;  %vm889_vm7 = vmor %vm887_vm6, %vm888_vm5  ;;  %v3058_v0 = vmul.f32 0.70710677, %v3041_v22 }
 0x13a   : > { %v1421_v31 = vmul.f32 2.1237322e-06, %v3048_v57  ;;  %2253 = vrcp.f32 %v3050_v12  ;;  %v992_v24 = vmul.f32 3.8918573e-05, %v2746_v33  ;;  %v3062_v44 = vadd.f32 1.1283791, %v1069_v6 }
 0x13b   : > { %v2145_v35 = vclamps-f32 %v856_v50, 1.0  ;;  %v890_v15 = vsel %vm889_vm7, %v2252_v46, %v886_v13  ;;  %vm892_vm8 = vcmp.eq.f32.partialorder %v891_v47, 8.507059e+37  ;;  %v1347_v1 = vmul.f32 %v1346_v54, %v2963_v3 }
 0x13c   : > { %v1107_v48 = vmul.f32 %v1106_v5, %v2951_v16  ;;  %v1144_v63 = vadd.f32 0.0036580483, %v1143_v59  ;;  %v895_v45 = vsel %vm892_vm8, %v894_v30, %v890_v15  ;;  %v1386_v32 = vadd.f32 0.05243302, %v1385_v42 }
 0x13d   : > { %v896_v55 = vmul.f32 %v895_v45, %v2865_v62  ;;  %v3068_v53 = vmul.f32 0.70710677, %v3053_v36  ;;  %v953_v34 = vadd.f32 0.001143296, %v952_v37  ;;  %v3071_v11 = vmul.f32 0.5, %v2900_v41 }
 0x13e   : > { %v1422_v6 = vadd.f32 0.00028619796, %v1421_v31  ;;  %v1179_v46 = vmul.f32 %v3058_v0, %v3058_v0  ;;  %v993_v50 = vadd.f32 0.001143296, %v992_v24  ;;  %v1787_v10 = vadd.f32 1.0, %v2145_v35 }
 0x13f   : > { %v2146_v54 = vclamps-f32 %v896_v55, 1.0  ;;  %v954_v5 = vmul.f32 %v953_v34, %v2714_v8  ;;  %v1032_v59 = vmul.f32 3.8918573e-05, %v2822_v38  ;;  %v1348_v62 = vadd.f32 0.18741608, %v1347_v1 }
 0x140   : > { %v2254_v47 = vpop.eup %2253  ;;  %v1108_v42 = vadd.f32 0.18741608, %v1107_v48  ;;  %v1145_v18 = vmul.f32 %v1144_v63, %v3000_v43  ;;  %v994_v13 = vmul.f32 %v993_v50, %v2746_v33  ;;  %v1387_v41 = vmul.f32 %v1386_v32, %v2981_v28 }
 0x141   : > { %v1788_v30 = vadd.f32 1.0, %v2146_v54  ;;  %v1459_v37 = vmul.f32 %v3068_v53, %v3068_v53  ;;  %v923_v31 = vmul.f32 %v2254_v47, %v3050_v12  ;;  %v1423_v24 = vmul.f32 %v1422_v6, %v3048_v57 }
 0x142   : > { %v3084_v35 = vmin.f32 %v1179_v46, 16.0  ;;  %v955_v15 = vadd.f32 0.014752088, %v954_v5  ;;  %v995_v45 = vadd.f32 0.014752088, %v994_v13  ;;  %v1819_v1 = vmul.f32 %v1787_v10, %v2724_v9 }
 0x143   : > { %v1820_v48 = vmul.f32 %v1788_v30, %v2753_v58  ;;  %v924_v63 = vsub.f32 1.0, %v923_v31  ;;  %v1033_v55 = vadd.f32 0.001143296, %v1032_v59  ;;  %vm927_vm9 = vweird.f32 %v3050_v12 }
 0x144   : > { %v956_v32 = vmul.f32 %v955_v15, %v2714_v8  ;;  %v996_v34 = vmul.f32 %v995_v45, %v2746_v33  ;;  %v1072_v50 = vmul.f32 3.8918573e-05, %v2850_v21  ;;  %v3092_v6 = vmin.f32 %v1459_v37, 16.0 }
 0x145   : > { %v1847_v54 = vpack.c.bf16 %v1820_v48, %v1819_v1  ;;  %v925_v46 = vmul.f32 %v2254_v47, %v924_v63  ;;  %v1034_v5 = vmul.f32 %v1033_v55, %v2822_v38  ;;  %v1181_v9 = vmul.f32 2.1237322e-06, %v3084_v35 }
 0x146   : > { %vm928_vm10 = vweird.f32 %v2254_v47  ;;  %v957_v58 = vadd.f32 0.112945676, %v956_v32  ;;  %v997_v10 = vadd.f32 0.112945676, %v996_v34  ;;  %v1424_v59 = vadd.f32 0.0036580483, %v1423_v24 }
 0x147   : > { %1955 = vmatmul.bf16.gmra.mxu1 %v1847_v54  ;;  %v926_v13 = vadd.f32 %v2254_v47, %v925_v46  ;;  %v933_v30 = vand.u32 2147483648, %v3050_v12  ;;  %v1035_v31 = vadd.f32 0.014752088, %v1034_v5  ;;  %v931_v15 = vand.u32 2147483647, %v3050_v12  ;;  %vm3105_vm11 = vmor %vm927_vm9, %vm928_vm10  ;;  %v417_v5 = vpop.f32.mrf.mxu3 }
 0x148   : > { %v958_v45 = vmul.f32 %v957_v58, %v2714_v8  ;;  %v998_v37 = vmul.f32 %v997_v10, %v2746_v33  ;;  %v1073_v1 = vadd.f32 0.001143296, %v1072_v50  ;;  %v1349_v48 = vmul.f32 %v1348_v62, %v2963_v3 }
 0x149   : > { %v1146_v63 = vadd.f32 0.05243302, %v1145_v18  ;;  %v1461_v55 = vmul.f32 2.1237322e-06, %v3092_v6  ;;  %v1036_v32 = vmul.f32 %v1035_v31, %v2822_v38  ;;  %v1388_v34 = vadd.f32 0.18741608, %v1387_v41 }
 0x14a   : > { %v1182_v54 = vadd.f32 0.00028619796, %v1181_v9  ;;  %v930_v46 = vsel %vm3105_vm11, %v2254_v47, %v926_v13  ;;  %v959_v50 = vadd.f32 0.4994258, %v958_v45  ;;  %v1425_v62 = vmul.f32 %v1424_v59, %v3048_v57 }
 0x14b   : > { %v934_v18 = vor.u32 1.1754944e-38, %v933_v30  ;;  %v999_v58 = vadd.f32 0.4994258, %v998_v37  ;;  %v1037_v10 = vadd.f32 0.112945676, %v1036_v32  ;;  %vm932_vm12 = vcmp.eq.f32.partialorder %v931_v15, 8.507059e+37 }
 0x14c   : > { %v960_v12 = vmul.f32 %v959_v50, %v2714_v8  ;;  %v3115_v39 = vadd.f32 %v2897_v49, %v417_v5  ;;  %v1074_v31 = vmul.f32 %v1073_v1, %v2850_v21  ;;  %v1462_v41 = vadd.f32 0.00028619796, %v1461_v55 }
 0x14d   : > { %v935_v9 = vsel %vm932_vm12, %v934_v18, %v930_v46  ;;  %v1000_v24 = vmul.f32 %v999_v58, %v2746_v33  ;;  %v1038_v47 = vmul.f32 %v1037_v10, %v2822_v38  ;;  %v1350_v13 = vadd.f32 1.1283791, %v1349_v48 }
 0x14e   : > { %v1109_v59 = vmul.f32 %v1108_v42, %v2951_v16  ;;  %v1147_v30 = vmul.f32 %v1146_v63, %v3000_v43  ;;  %v3122_v45 = vadd.f32 1.0, %v960_v12  ;;  %v1426_v15 = vadd.f32 0.05243302, %v1425_v62 }
 0x14f   : > { %v1183_v8 = vmul.f32 %v1182_v54, %v3084_v35  ;;  %v3125_v37 = vadd.f32 1.0, %v1000_v24  ;;  %v1039_v32 = vadd.f32 0.4994258, %v1038_v47  ;;  %v936_v1 = vmul.f32 %v935_v9, %v2876_v51 }
 0x150   : > { %2255 = vrcp.f32 %v3122_v45  ;;  %v3130_v33 = vmul.f32 0.70710677, %v3115_v39  ;;  %v1075_v48 = vadd.f32 0.014752088, %v1074_v31  ;;  %v3134_v42 = vmul.f32 %v3062_v44, %v2825_v19 }
 0x151   : > { %v3137_v63 = vmul.f32 0.5, %v2942_v27  ;;  %v1389_v55 = vmul.f32 %v1388_v34, %v2981_v28  ;;  %v1463_v54 = vmul.f32 %v1462_v41, %v3092_v6  ;;  %v3142_v46 = vmul.f32 %v1350_v13, %v2926_v20  ;;  %v420_v27 = vpop.f32.mrf.mxu3 }
 0x152   : > { %v1110_v51 = vadd.f32 1.1283791, %v1109_v59  ;;  %v3145_v50 = vmul.f32 0.5, %v2957_v23  ;;  %2257 = vrcp.f32 %v3125_v37  ;;  %v3148_v62 = vadd.f32 0.18741608, %v1147_v30 }
 0x153   : > { %3913 = vst [vmem:[#allocation14_spill] sm:$0xff] %v3137_v63  ;;  %v1427_v19 = vmul.f32 %v1426_v15, %v3048_v57  ;;  %v1184_v44 = vadd.f32 0.0036580483, %v1183_v8  ;;  %v1040_v18 = vmul.f32 %v1039_v32, %v2822_v38  ;;  %v2147_v34 = vclamps-f32 %v936_v1, 1.0 }
 0x154   : > { %3914 = vst [vmem:[#allocation15_spill] sm:$0xff] %v3142_v46  ;;  %v1499_v5 = vmul.f32 %v3130_v33, %v3130_v33  ;;  %v3155_v20 = vadd.f32 %v2897_v49, %v420_v27  ;;  %v1076_v23 = vmul.f32 %v1075_v48, %v2850_v21  ;;  %v3158_v58 = vadd.f32 1.1283791, %v1389_v55 }
 0x155   : > { %v3161_v10 = vmul.f32 0.5, %v3008_v17  ;;  %v3163_v12 = vadd.f32 0.0036580483, %v1463_v54  ;;  %v3165_v31 = vadd.f32 1.0, %v1040_v18  ;;  %v3168_v38 = vmul.f32 %v1110_v51, %v2917_v60 }
 0x156   : > { %3915 = vst [vmem:[#allocation16_spill] sm:$0xff] %v3155_v20  ;;  %v2256_v41 = vpop.eup %2255  ;;  %v971_v9 = vand.u32 2147483647, %v3122_v45  ;;  %v3172_v24 = vmul.f32 0.70710677, %v3155_v20  ;;  %v3177_v59 = vmul.f32 %v1184_v44, %v3084_v35  ;;  %v973_v15 = vand.u32 2147483648, %v3122_v45 }
 0x157   : > { %3916 = vst [vmem:[#allocation17_spill] sm:$0xff] %v3161_v10  ;;  %v1077_v47 = vadd.f32 0.112945676, %v1076_v23  ;;  %v3174_v13 = vadd.f32 0.18741608, %v1427_v19  ;;  %v963_v17 = vmul.f32 %v2256_v41, %v3122_v45  ;;  %2259 = vrcp.f32 %v3165_v31 }
 0x158   : > { %v2258_v30 = vpop.eup %2257  ;;  %v1789_v60 = vadd.f32 1.0, %v2147_v34  ;;  %v3182_v8 = vmin.f32 %v1499_v5, 16.0  ;;  %v1539_v32 = vmul.f32 %v3172_v24, %v3172_v24  ;;  %vm967_vm13 = vweird.f32 %v3122_v45 }
 0x159   : > { %v964_v1 = vsub.f32 1.0, %v963_v17  ;;  %v1003_v48 = vmul.f32 %v2258_v30, %v3125_v37  ;;  %v1011_v55 = vand.u32 2147483647, %v3125_v37  ;;  %vm3189_vm14 = vcmp.eq.f32.partialorder %v971_v9, 8.507059e+37  ;;  %v422_v5 = vpop.f32.mrf.mxu3 }
 0x15a   : > { %v1501_v51 = vmul.f32 2.1237322e-06, %v3182_v8  ;;  %v1013_v19 = vand.u32 2147483648, %v3125_v37  ;;  %v1078_v44 = vmul.f32 %v1077_v47, %v2850_v21  ;;  %vm968_vm15 = vweird.f32 %v2256_v41 }
 0x15b   : > { %v965_v27 = vmul.f32 %v2256_v41, %v964_v1  ;;  %v3196_v18 = vmin.f32 %v1539_v32, 16.0  ;;  %v1004_v34 = vsub.f32 1.0, %v1003_v48  ;;  %v974_v23 = vor.u32 1.1754944e-38, %v973_v15  ;;  %vm969_vm2 = vmor %vm967_vm13, %vm968_vm15 }
 0x15c   : > { %vm1007_vm0 = vweird.f32 %v3125_v37  ;;  %v3200_v9 = vadd.f32 %v2897_v49, %v422_v5  ;;  %v1079_v17 = vadd.f32 0.4994258, %v1078_v44  ;;  %vm3203_vm1 = vcmp.eq.f32.partialorder %v1011_v55, 8.507059e+37 }
 0x15d   : > { %v2260_v20 = vpop.eup %2259  ;;  %v966_v10 = vadd.f32 %v2256_v41, %v965_v27  ;;  %v1541_v63 = vmul.f32 2.1237322e-06, %v3196_v18  ;;  %v1005_v46 = vmul.f32 %v2258_v30, %v1004_v34  ;;  %vm1008_vm3 = vweird.f32 %v2258_v30 }
 0x15e   : > { %v1014_v15 = vor.u32 1.1754944e-38, %v1013_v19  ;;  %v1043_v32 = vmul.f32 %v2260_v20, %v3165_v31  ;;  %v1112_v1 = vmul.f32 3.8918573e-05, %v2951_v16  ;;  %v1502_v44 = vadd.f32 0.00028619796, %v1501_v51  ;;  %vm3221_vm4 = vmor %vm1007_vm0, %vm1008_vm3 }
 0x15f   : > { %v970_v48 = vsel %vm969_vm2, %v2256_v41, %v966_v10  ;;  %v1006_v5 = vadd.f32 %v2258_v30, %v1005_v46  ;;  %v3212_v27 = vmul.f32 0.70710677, %v3200_v9  ;;  %v1053_v4 = vand.u32 2147483648, %v3165_v31 }
 0x160   : > { %v975_v55 = vsel %vm3189_vm14, %v974_v23, %v970_v48  ;;  %v1044_v34 = vsub.f32 1.0, %v1043_v32  ;;  %v1080_v45 = vmul.f32 %v1079_v17, %v2850_v21  ;;  %v1542_v52 = vadd.f32 0.00028619796, %v1541_v63 }
 0x161   : > { %v976_v19 = vmul.f32 %v975_v55, %v2990_v29  ;;  %v1051_v46 = vand.u32 2147483647, %v3165_v31  ;;  %v1579_v41 = vmul.f32 %v3212_v27, %v3212_v27  ;;  %v1010_v54 = vsel %vm3221_vm4, %v2258_v30, %v1006_v5  ;;  %v425_v23 = vpop.f32.mrf.mxu3 }
 0x162   : > { %v1045_v51 = vmul.f32 %v2260_v20, %v1044_v34  ;;  %vm1048_vm5 = vweird.f32 %v2260_v20  ;;  %v3230_v21 = vadd.f32 1.0, %v1080_v45  ;;  %v1503_v63 = vmul.f32 %v1502_v44, %v3182_v8 }
 0x163   : > { %v2148_v29 = vclamps-f32 %v976_v19, 1.0  ;;  %vm1047_vm6 = vweird.f32 %v3165_v31  ;;  %v3234_v37 = vmin.f32 %v1579_v41, 16.0  ;;  %v1054_v32 = vor.u32 1.1754944e-38, %v1053_v4 }
 0x164   : > { %v1046_v17 = vadd.f32 %v2260_v20, %v1045_v51  ;;  %v3237_v48 = vadd.f32 %v2897_v49, %v425_v23  ;;  %2261 = vrcp.f32 %v3230_v21  ;;  %v1015_v5 = vsel %vm3203_vm1, %v1014_v15, %v1010_v54  ;;  %vm1049_vm7 = vmor %vm1047_vm6, %vm1048_vm5 }
 0x165   : > { %v1790_v30 = vadd.f32 1.0, %v2148_v29  ;;  %v1581_v55 = vmul.f32 2.1237322e-06, %v3234_v37  ;;  %v1113_v44 = vadd.f32 0.001143296, %v1112_v1  ;;  %v1821_v31 = vmul.f32 %v1789_v60, %v2777_v2  ;;  %v3923_v29 = vld [vmem:[#allocation10_spill] sm:$0xff] }
 0x166   : > { %v1543_v34 = vmul.f32 %v1542_v52, %v3196_v18  ;;  %v1050_v45 = vsel %vm1049_vm7, %v2260_v20, %v1046_v17  ;;  %vm1052_vm8 = vcmp.eq.f32.partialorder %v1051_v46, 8.507059e+37  ;;  %v1504_v19 = vadd.f32 0.0036580483, %v1503_v63 }
 0x167   : > { %v1822_v4 = vmul.f32 %v1790_v30, %v2795_v61  ;;  %v1055_v10 = vsel %vm1052_vm8, %v1054_v32, %v1050_v45  ;;  %v1152_v41 = vmul.f32 3.8918573e-05, %v3000_v43  ;;  %v1016_v51 = vmul.f32 %v1015_v5, %v2993_v14 }
 0x168   : > { %v1056_v47 = vmul.f32 %v1055_v10, %v3019_v56  ;;  %v1582_v15 = vadd.f32 0.00028619796, %v1581_v55  ;;  %v3250_v54 = vmul.f32 0.70710677, %v3237_v48  ;;  %v1149_v2 = vmul.f32 %v3148_v62, %v3000_v43 }
 0x169   : > { %v3255_v52 = vmul.f32 0.5, %v3041_v22  ;;  %v1848_v20 = vpack.c.bf16 %v1822_v4, %v1821_v31  ;;  %v1114_v61 = vmul.f32 %v1113_v44, %v2951_v16  ;;  %v1429_v14 = vmul.f32 %v3174_v13, %v3048_v57 }
 0x16a   : > { %v3258_v60 = vpop.eup %2261  ;;  %v1186_v56 = vadd.f32 0.05243302, %v3177_v59  ;;  %v1465_v1 = vmul.f32 %v3163_v12, %v3092_v6  ;;  %v1544_v46 = vadd.f32 0.0036580483, %v1543_v34  ;;  %v3267_v62 = vmul.f32 %v3158_v58, %v3923_v29 }
 0x16b   : > { %1960 = vmatmul.bf16.gmra.mxu1 %v1848_v20  ;;  %v2150_v22 = vclamps-f32 %v1056_v47, 1.0  ;;  %v1083_v63 = vmul.f32 %v3258_v60, %v3230_v21  ;;  %v1153_v23 = vadd.f32 0.001143296, %v1152_v41  ;;  %v1505_v17 = vmul.f32 %v1504_v19, %v3182_v8 }
 0x16c   : > { %v2149_v32 = vclamps-f32 %v1016_v51, 1.0  ;;  %v1583_v13 = vmul.f32 %v1582_v15, %v3234_v37  ;;  %v1619_v59 = vmul.f32 %v3250_v54, %v3250_v54  ;;  %v3275_v12 = vadd.f32 1.1283791, %v1149_v2 }
 0x16d   : > { %v3278_v30 = vmul.f32 0.5, %v3053_v36  ;;  %v1084_v58 = vsub.f32 1.0, %v1083_v63  ;;  %v1115_v5 = vadd.f32 0.014752088, %v1114_v61  ;;  %v3280_v55 = vadd.f32 1.1283791, %v1429_v14 }
 0x16e   : > { %v1187_v44 = vmul.f32 %v1186_v56, %v3084_v35  ;;  %v1466_v31 = vadd.f32 0.05243302, %v1465_v1  ;;  %v1545_v34 = vmul.f32 %v1544_v46, %v3196_v18  ;;  %v1792_v45 = vadd.f32 1.0, %v2150_v22  ;;  %v3924_v46 = vld [vmem:[#allocation2_spill] sm:$0xff]  ;;  %v3925_v22 = vld [vmem:[#allocation7_spill] sm:$0xff] }
 0x16f   : > { %v1116_v4 = vmul.f32 %v1115_v5, %v2951_v16  ;;  %v1154_v19 = vmul.f32 %v1153_v23, %v3000_v43  ;;  %v1192_v10 = vmul.f32 3.8918573e-05, %v3084_v35  ;;  %v1506_v41 = vadd.f32 0.05243302, %v1505_v17 }
 0x170   : > { %v1791_v51 = vadd.f32 1.0, %v2149_v32  ;;  %v1584_v36 = vadd.f32 0.0036580483, %v1583_v13  ;;  %v3287_v47 = vmin.f32 %v1619_v59, 16.0  ;;  %v1085_v15 = vmul.f32 %v3258_v60, %v1084_v58  ;;  %v3926_v13 = vld [vmem:[#allocation4_spill] sm:$0xff] }
 0x171   : > { %v1117_v2 = vadd.f32 0.112945676, %v1116_v4  ;;  %v1155_v20 = vadd.f32 0.014752088, %v1154_v19  ;;  %v1193_v61 = vadd.f32 0.001143296, %v1192_v10  ;;  %v1467_v14 = vmul.f32 %v1466_v31, %v3092_v6 }
 0x172   : > { %v1546_v56 = vadd.f32 0.05243302, %v1545_v34  ;;  %v1621_v1 = vmul.f32 2.1237322e-06, %v3287_v47  ;;  %v1232_v29 = vmul.f32 3.8918573e-05, %v3924_v46  ;;  %v1824_v63 = vmul.f32 %v1792_v45, %v3925_v22 }
 0x173   : > { %v1118_v23 = vmul.f32 %v1117_v2, %v2951_v16  ;;  %v1156_v17 = vmul.f32 %v1155_v20, %v3000_v43  ;;  %v1194_v32 = vmul.f32 %v1193_v61, %v3084_v35  ;;  %v1823_v59 = vmul.f32 %v1791_v51, %v3926_v13 }
 0x174   : > { %v1585_v58 = vmul.f32 %v1584_v36, %v3234_v37  ;;  %vm1088_vm9 = vweird.f32 %v3258_v60  ;;  %v1233_v5 = vadd.f32 0.001143296, %v1232_v29  ;;  %v1086_v31 = vadd.f32 %v3258_v60, %v1085_v15 }
 0x175   : > { %v1119_v34 = vadd.f32 0.4994258, %v1118_v23  ;;  %v1157_v4 = vadd.f32 0.112945676, %v1156_v17  ;;  %v1195_v19 = vadd.f32 0.014752088, %v1194_v32  ;;  %vm1087_vm10 = vweird.f32 %v3230_v21 }
 0x176   : > { %v1188_v10 = vadd.f32 0.18741608, %v1187_v44  ;;  %v1091_v45 = vand.u32 2147483647, %v3230_v21  ;;  %v1093_v2 = vand.u32 2147483648, %v3230_v21  ;;  %v1849_v20 = vpack.c.bf16 %v1824_v63, %v1823_v59  ;;  %vm3309_vm11 = vmor %vm1087_vm10, %vm1088_vm9  ;;  %v427_v44 = vpop.f32.mrf.mxu3 }
 0x177   : > { %v1622_v61 = vadd.f32 0.00028619796, %v1621_v1  ;;  %v1120_v51 = vmul.f32 %v1119_v34, %v2951_v16  ;;  %v1158_v36 = vmul.f32 %v1157_v4, %v3000_v43  ;;  %v1468_v22 = vadd.f32 0.18741608, %v1467_v14 }
 0x178   : > { %v1507_v29 = vmul.f32 %v1506_v41, %v3182_v8  ;;  %v1196_v23 = vmul.f32 %v1195_v19, %v3084_v35  ;;  %v1234_v21 = vmul.f32 %v1233_v5, %v3924_v46  ;;  %v1547_v1 = vmul.f32 %v1546_v56, %v3196_v18 }
 0x179   : > { %v1586_v63 = vadd.f32 0.05243302, %v1585_v58  ;;  %v1090_v16 = vsel %vm3309_vm11, %v3258_v60, %v1086_v31  ;;  %v3319_v41 = vadd.f32 1.0, %v1120_v51  ;;  %v1189_v14 = vmul.f32 %v1188_v10, %v3084_v35  ;;  %v3330_v60 = vld [vmem:[%s3884_s4] ss:$0 sm:$0xff]  ;;  %v1936_v58 = vpop.f32.mrf.mxu1 }
 0x17a   : > { %v1094_v17 = vor.u32 1.1754944e-38, %v1093_v2  ;;  %v1159_v32 = vadd.f32 0.4994258, %v1158_v36  ;;  %v1197_v13 = vadd.f32 0.112945676, %v1196_v23  ;;  %v1623_v59 = vmul.f32 %v1622_v61, %v3287_v47 }
 0x17b   : > { %1965 = vmatmul.bf16.gmra.mxu1 %v1849_v20  ;;  %vm1092_vm12 = vcmp.eq.f32.partialorder %v1091_v45, 8.507059e+37  ;;  %2263 = vrcp.f32 %v3319_v41  ;;  %v3325_v56 = vadd.f32 %v2897_v49, %v427_v44  ;;  %v1508_v5 = vadd.f32 0.18741608, %v1507_v29 }
 0x17c   : > { %v1095_v31 = vsel %vm1092_vm12, %v1094_v17, %v1090_v16  ;;  %v1160_v34 = vmul.f32 %v1159_v32, %v3000_v43  ;;  %v1235_v4 = vadd.f32 0.014752088, %v1234_v21  ;;  %v1548_v49 = vadd.f32 0.18741608, %v1547_v1 }
 0x17d   : > { %v1587_v19 = vmul.f32 %v1586_v63, %v3234_v37  ;;  %v1937_v10 = vadd.f32 %v3330_v60, %v1936_v58  ;;  %v1198_v45 = vmul.f32 %v1197_v13, %v3084_v35  ;;  %v1190_v2 = vadd.f32 1.1283791, %v1189_v14 }
 0x17e   : > { %v1469_v20 = vmul.f32 %v1468_v22, %v3092_v6  ;;  %v3344_v61 = vadd.f32 1.0, %v1160_v34  ;;  %v1272_v51 = vmul.f32 3.8918573e-05, %v2806_v40  ;;  %v1624_v36 = vadd.f32 0.0036580483, %v1623_v59 }
 0x17f   : > { %v1096_v29 = vmul.f32 %v1095_v31, %v3134_v42  ;;  %v3349_v43 = vmul.f32 0.70710677, %v3325_v56  ;;  %2016 = vst [vmem:[%s3337_s6] sm:$0xff] %v1937_v10  ;;  %v1199_v15 = vadd.f32 0.4994258, %v1198_v45  ;;  %v3354_v44 = vmul.f32 %v3275_v12, %v2973_v26 }
 0x180   : > { %v3358_v23 = vmul.f32 %v3280_v55, %v3023_v25  ;;  %2265 = vrcp.f32 %v3344_v61  ;;  %v1236_v22 = vmul.f32 %v1235_v4, %v3924_v46  ;;  %v3363_v42 = vmul.f32 0.5, %v3115_v39 }
 0x181   : > { %v2264_v21 = vpop.eup %2263  ;;  %v1509_v1 = vmul.f32 %v1508_v5, %v3182_v8  ;;  %v1549_v63 = vmul.f32 %v1548_v49, %v3196_v18  ;;  %v1588_v16 = vadd.f32 0.18741608, %v1587_v19  ;;  %v3367_v14 = vadd.f32 1.1283791, %v1469_v20  ;;  %v1938_v19 = vpop.f32.mrf.mxu1 }
 0x182   : > { %v1123_v26 = vmul.f32 %v2264_v21, %v3319_v41  ;;  %v1200_v25 = vmul.f32 %v1199_v15, %v3084_v35  ;;  %v1273_v12 = vadd.f32 0.001143296, %v1272_v51  ;;  %v3372_v55 = vmul.f32 %v1190_v2, %v3058_v0  ;;  %v430_v15 = vpop.f32.mrf.mxu3 }
 0x183   : > { %v1625_v17 = vmul.f32 %v1624_v36, %v3287_v47  ;;  %v2151_v32 = vclamps-f32 %v1096_v29, 1.0  ;;  %v1659_v39 = vmul.f32 %v3349_v43, %v3349_v43  ;;  %v1133_v59 = vand.u32 2147483648, %v3319_v41 }
 0x184   : > { %v1124_v13 = vsub.f32 1.0, %v1123_v26  ;;  %v3378_v58 = vadd.f32 1.0, %v1200_v25  ;;  %v1237_v5 = vadd.f32 0.112945676, %v1236_v22  ;;  %v3380_v31 = vadd.f32 1.1283791, %v1509_v1 }
 0x185   : > { %v3382_v34 = vadd.f32 1.1283791, %v1549_v63  ;;  %v3385_v35 = vmul.f32 %v1588_v16, %v3234_v37  ;;  %v1131_v0 = vand.u32 2147483647, %v3319_v41  ;;  %vm1128_vm13 = vweird.f32 %v2264_v21  ;;  %v3399_v63 = vld [vmem:[%s3882_s2] ss:$0 sm:$0xff] }
 0x186   : > { %v2266_v4 = vpop.eup %2265  ;;  %v1125_v49 = vmul.f32 %v2264_v21, %v1124_v13  ;;  %2267 = vrcp.f32 %v3378_v58  ;;  %v1274_v10 = vmul.f32 %v1273_v12, %v2806_v40  ;;  %v1626_v45 = vadd.f32 0.05243302, %v1625_v17 }
 0x187   : > { %v1793_v2 = vadd.f32 1.0, %v2151_v32  ;;  %v3390_v20 = vmin.f32 %v1659_v39, 16.0  ;;  %v1163_v51 = vmul.f32 %v2266_v4, %v3344_v61  ;;  %vm1127_vm14 = vweird.f32 %v3319_v41 }
 0x188   : > { %v1126_v36 = vadd.f32 %v2264_v21, %v1125_v49  ;;  %v1134_v29 = vor.u32 1.1754944e-38, %v1133_v59  ;;  %v1238_v22 = vmul.f32 %v1237_v5, %v3924_v46  ;;  %vm1129_vm15 = vmor %vm1127_vm14, %vm1128_vm13  ;;  %v3402_v16 = vadd.f32 %v3399_v63, %v430_v15 }
 0x189   : > { %v1661_v1 = vmul.f32 2.1237322e-06, %v3390_v20  ;;  %v1164_v26 = vsub.f32 1.0, %v1163_v51  ;;  %v1939_v25 = vadd.f32 %v3330_v60, %v1938_v19  ;;  %vm1132_vm0 = vcmp.eq.f32.partialorder %v1131_v0, 8.507059e+37  ;;  %v1941_v15 = vpop.f32.mrf.mxu1 }
 0x18a   : > { %3929 = vst [vmem:[#allocation10_spill] sm:$0xff] %v3402_v16  ;;  %v1130_v41 = vsel %vm1129_vm15, %v2264_v21, %v1126_v36  ;;  %v1173_v12 = vand.u32 2147483648, %v3344_v61  ;;  %v1275_v17 = vadd.f32 0.014752088, %v1274_v10  ;;  %vm1168_vm1 = vweird.f32 %v2266_v4 }
 0x18b   : > { %v1135_v32 = vsel %vm1132_vm0, %v1134_v29, %v1130_v41  ;;  %v1165_v39 = vmul.f32 %v2266_v4, %v1164_v26  ;;  %v1171_v13 = vand.u32 2147483647, %v3344_v61  ;;  %2017 = vst [vmem:[%s3337_s6 + $0x8] sm:$0xff] %v1939_v25  ;;  %vm1167_vm2 = vweird.f32 %v3344_v61 }
 0x18c   : > { %v2268_v59 = vpop.eup %2267  ;;  %v1136_v5 = vmul.f32 %v1135_v32, %v3168_v38  ;;  %v1239_v49 = vadd.f32 0.4994258, %v1238_v22  ;;  %v1312_v51 = vmul.f32 3.8918573e-05, %v2842_v7  ;;  %v1662_v19 = vadd.f32 0.00028619796, %v1661_v1  ;;  %vm1169_vm3 = vmor %vm1167_vm2, %vm1168_vm1 }
 0x18d   : > { %v3412_v21 = vmul.f32 0.70710677, %v3402_v16  ;;  %v1166_v0 = vadd.f32 %v2266_v4, %v1165_v39  ;;  %v1203_v10 = vmul.f32 %v2268_v59, %v3378_v58  ;;  %v1174_v29 = vor.u32 1.1754944e-38, %v1173_v12 }
 0x18e   : > { %v2152_v36 = vclamps-f32 %v1136_v5, 1.0  ;;  %v1240_v26 = vmul.f32 %v1239_v49, %v3924_v46  ;;  %v1276_v38 = vmul.f32 %v1275_v17, %v2806_v40  ;;  %vm1172_vm4 = vcmp.eq.f32.partialorder %v1171_v13, 8.507059e+37 }
 0x18f   : > { %v1170_v61 = vsel %vm1169_vm3, %v2266_v4, %v1166_v0  ;;  %v1204_v22 = vsub.f32 1.0, %v1203_v10  ;;  %v1942_v1 = vadd.f32 %v3330_v60, %v1941_v15  ;;  %v1211_v32 = vand.u32 2147483647, %v3378_v58  ;;  %v3930_v4 = vld [vmem:[#allocation9_spill] sm:$0xff] }
 0x190   : > { %v1794_v25 = vadd.f32 1.0, %v2152_v36  ;;  %v1175_v41 = vsel %vm1172_vm4, %v1174_v29, %v1170_v61  ;;  %v1213_v39 = vand.u32 2147483648, %v3378_v58  ;;  %vm1208_vm5 = vweird.f32 %v2268_v59 }
 0x191   : > { %v1176_v5 = vmul.f32 %v1175_v41, %v3354_v44  ;;  %v1205_v16 = vmul.f32 %v2268_v59, %v1204_v22  ;;  %2018 = vst [vmem:[%s3337_s6 + $0x10] sm:$0xff] %v1942_v1  ;;  %v3422_v12 = vadd.f32 1.0, %v1240_v26  ;;  %v1627_v46 = vmul.f32 %v1626_v45, %v3287_v47  ;;  %v1943_v41 = vpop.f32.mrf.mxu1 }
 0x192   : > { %v1825_v17 = vmul.f32 %v1793_v2, %v3930_v4  ;;  %v1826_v13 = vmul.f32 %v1794_v25, %v3071_v11  ;;  %v1277_v49 = vadd.f32 0.112945676, %v1276_v38  ;;  %vm1207_vm6 = vweird.f32 %v3378_v58 }
 0x193   : > { %v2153_v0 = vclamps-f32 %v1176_v5, 1.0  ;;  %v1206_v10 = vadd.f32 %v2268_v59, %v1205_v16  ;;  %2269 = vrcp.f32 %v3422_v12  ;;  %v1699_v44 = vmul.f32 %v3412_v21, %v3412_v21  ;;  %vm1209_vm7 = vmor %vm1207_vm6, %vm1208_vm5 }
 0x194   : > { %v1850_v36 = vpack.c.bf16 %v1826_v13, %v1825_v17  ;;  %v1214_v29 = vor.u32 1.1754944e-38, %v1213_v39  ;;  %v1313_v15 = vadd.f32 0.001143296, %v1312_v51  ;;  %v1663_v45 = vmul.f32 %v1662_v19, %v3390_v20  ;;  %v432_v17 = vpop.f32.mrf.mxu3 }
 0x195   : > { %v1210_v26 = vsel %vm1209_vm7, %v2268_v59, %v1206_v10  ;;  %vm1212_vm8 = vcmp.eq.f32.partialorder %v1211_v32, 8.507059e+37  ;;  %v1352_v11 = vmul.f32 3.8918573e-05, %v2963_v3  ;;  %v3435_v2 = vmul.f32 %v3367_v14, %v3068_v53 }
 0x196   : > { %v3439_v58 = vmul.f32 %v3380_v31, %v3130_v33  ;;  %1970 = vmatmul.bf16.gmra.mxu1 %v1850_v36  ;;  %v1215_v16 = vsel %vm1212_vm8, %v1214_v29, %v1210_v26  ;;  %v1278_v38 = vmul.f32 %v1277_v49, %v2806_v40  ;;  %v3444_v51 = vmul.f32 %v3382_v34, %v3172_v24 }
 0x197   : > { %v1590_v59 = vadd.f32 1.1283791, %v3385_v35  ;;  %v1216_v19 = vmul.f32 %v1215_v16, %v3372_v55  ;;  %v1795_v61 = vadd.f32 1.0, %v2153_v0  ;;  %v1628_v22 = vadd.f32 0.18741608, %v1627_v46 }
 0x198   : > { %v3448_v53 = vmin.f32 %v1699_v44, 16.0  ;;  %v1279_v14 = vadd.f32 0.4994258, %v1278_v38  ;;  %v1314_v33 = vmul.f32 %v1313_v15, %v2842_v7  ;;  %v1664_v1 = vadd.f32 0.0036580483, %v1663_v45 }
 0x199   : > { %v2270_v31 = vpop.eup %2269  ;;  %v2154_v25 = vclamps-f32 %v1216_v19, 1.0  ;;  %vm1247_vm9 = vweird.f32 %v3422_v12  ;;  %v1353_v24 = vadd.f32 0.001143296, %v1352_v11  ;;  %v1251_v35 = vand.u32 2147483647, %v3422_v12 }
 0x19a   : > { %v1243_v34 = vmul.f32 %v2270_v31, %v3422_v12  ;;  %v1253_v55 = vand.u32 2147483648, %v3422_v12  ;;  %v1280_v32 = vmul.f32 %v1279_v14, %v2806_v40  ;;  %v1827_v5 = vmul.f32 %v1795_v61, %v3145_v50 }
 0x19b   : > { %v1796_v39 = vadd.f32 1.0, %v2154_v25  ;;  %v1944_v46 = vadd.f32 %v3330_v60, %v1943_v41  ;;  %v1315_v4 = vadd.f32 0.014752088, %v1314_v33  ;;  %vm1248_vm10 = vweird.f32 %v2270_v31 }
 0x19c   : > { %v1244_v13 = vsub.f32 1.0, %v1243_v34  ;;  %v1281_v49 = vadd.f32 1.0, %v1280_v32  ;;  %v1354_v0 = vmul.f32 %v1353_v24, %v2963_v3  ;;  %v1392_v44 = vmul.f32 3.8918573e-05, %v2981_v28  ;;  %vm3473_vm11 = vmor %vm1247_vm9, %vm1248_vm10 }
 0x19d   : > { %v1828_v10 = vmul.f32 %v1796_v39, %v3255_v52  ;;  %2019 = vst [vmem:[%s3337_s6 + $0x18] sm:$0xff] %v1944_v46  ;;  %v1316_v36 = vmul.f32 %v1315_v4, %v2842_v7  ;;  %v1432_v40 = vmul.f32 3.8918573e-05, %v3048_v57  ;;  %v3465_v50 = vmul.f32 %v1590_v59, %v3212_v27  ;;  %v3933_v39 = vld [vmem:[#allocation6_spill] sm:$0xff] }
 0x19e   : > { %v1701_v29 = vmul.f32 2.1237322e-06, %v3448_v53  ;;  %v1245_v15 = vmul.f32 %v2270_v31, %v1244_v13  ;;  %2271 = vrcp.f32 %v1281_v49  ;;  %v3469_v26 = vadd.f32 %v3399_v63, %v432_v17  ;;  %v1946_v63 = vpop.f32.mrf.mxu1 }
 0x19f   : > { %v1851_v45 = vpack.c.bf16 %v1828_v10, %v1827_v5  ;;  %v1254_v11 = vor.u32 1.1754944e-38, %v1253_v55  ;;  %v1317_v16 = vadd.f32 0.112945676, %v1316_v36  ;;  %vm1252_vm12 = vcmp.eq.f32.partialorder %v1251_v35, 8.507059e+37 }
 0x1a0   : > { %v1246_v38 = vadd.f32 %v2270_v31, %v1245_v15  ;;  %v1355_v27 = vadd.f32 0.014752088, %v1354_v0  ;;  %v1393_v59 = vadd.f32 0.001143296, %v1392_v44  ;;  %v3478_v19 = vmul.f32 %v1628_v22, %v3287_v47 }
 0x1a1   : > { %v3481_v61 = vmul.f32 %v1664_v1, %v3390_v20  ;;  %1975 = vmatmul.bf16.vlgmr.msra.gmra.mxu2 %v1851_v45  ;;  %v1318_v12 = vmul.f32 %v1317_v16, %v2842_v7  ;;  %v1433_v14 = vadd.f32 0.001143296, %v1432_v40  ;;  %v3484_v33 = vadd.f32 0.00028619796, %v1701_v29 }
 0x1a2   : > { %v1250_v25 = vsel %vm3473_vm11, %v2270_v31, %v1246_v38  ;;  %v1947_v41 = vadd.f32 %v3330_v60, %v1946_v63  ;;  %v1356_v24 = vmul.f32 %v1355_v27, %v2963_v3  ;;  %v1394_v1 = vmul.f32 %v1393_v59, %v2981_v28 }
 0x1a3   : > { %v1255_v22 = vsel %vm1252_vm12, %v1254_v11, %v1250_v25  ;;  %v1319_v34 = vadd.f32 0.4994258, %v1318_v12  ;;  %v1434_v35 = vmul.f32 %v1433_v14, %v3048_v57  ;;  %v3493_v32 = vmul.f32 0.70710677, %v3469_v26 }
 0x1a4   : > { %v2272_v55 = vpop.eup %2271  ;;  %v1256_v5 = vmul.f32 %v1255_v22, %v3933_v39  ;;  %vm1287_vm13 = vweird.f32 %v1281_v49  ;;  %2020 = vst [vmem:[%s3337_s6 + $0x20] sm:$0xff] %v1947_v41  ;;  %v1357_v46 = vadd.f32 0.112945676, %v1356_v24  ;;  %v1291_v4 = vand.u32 2147483647, %v1281_v49 }
 0x1a5   : > { %v1283_v31 = vmul.f32 %v2272_v55, %v1281_v49  ;;  %v1320_v17 = vmul.f32 %v1319_v34, %v2842_v7  ;;  %v1395_v13 = vadd.f32 0.014752088, %v1394_v1  ;;  %v1293_v10 = vand.u32 2147483648, %v1281_v49 }
 0x1a6   : > { %v2155_v0 = vclamps-f32 %v1256_v5, 1.0  ;;  %v1358_v36 = vmul.f32 %v1357_v46, %v2963_v3  ;;  %v1435_v44 = vadd.f32 0.014752088, %v1434_v35  ;;  %vm1288_vm14 = vweird.f32 %v2272_v55  ;;  %v1948_v59 = vpop.f32.mrf.mxu1  ;;  %v3938_v46 = vld [vmem:[#allocation3_spill] sm:$0xff] }
 0x1a7   : > { %v1284_v40 = vsub.f32 1.0, %v1283_v31  ;;  %v1321_v29 = vadd.f32 1.0, %v1320_v17  ;;  %v1396_v15 = vmul.f32 %v1395_v13, %v2981_v28  ;;  %v1739_v45 = vmul.f32 %v3493_v32, %v3493_v32  ;;  %vm3509_vm0 = vmor %vm1287_vm13, %vm1288_vm14 }
 0x1a8   : > { %v1359_v52 = vadd.f32 0.4994258, %v1358_v36  ;;  %v1436_v11 = vmul.f32 %v1435_v44, %v3048_v57  ;;  %v1472_v16 = vmul.f32 3.8918573e-05, %v3092_v6  ;;  %vm3504_vm15 = vcmp.eq.f32.partialorder %v1291_v4, 8.507059e+37  ;;  %v3939_v36 = vld [vmem:[#allocation11_spill] sm:$0xff] }
 0x1a9   : > { %v1285_v7 = vmul.f32 %v2272_v55, %v1284_v40  ;;  %v1797_v27 = vadd.f32 1.0, %v2155_v0  ;;  %2273 = vrcp.f32 %v1321_v29  ;;  %v1294_v12 = vor.u32 1.1754944e-38, %v1293_v10 }
 0x1aa   : > { %v1360_v14 = vmul.f32 %v1359_v52, %v2963_v3  ;;  %v1949_v25 = vadd.f32 %v3330_v60, %v1948_v59  ;;  %v1512_v41 = vmul.f32 3.8918573e-05, %v3182_v8  ;;  %v1331_v22 = vand.u32 2147483647, %v1321_v29 }
 0x1ab   : > { %v1286_v24 = vadd.f32 %v2272_v55, %v1285_v7  ;;  %v1397_v34 = vadd.f32 0.112945676, %v1396_v15  ;;  %v1437_v1 = vadd.f32 0.112945676, %v1436_v11  ;;  %v3516_v35 = vmin.f32 %v1739_v45, 16.0 }
 0x1ac   : > { %vm1327_vm1 = vweird.f32 %v1321_v29  ;;  %v3518_v39 = vadd.f32 1.0, %v1360_v14  ;;  %2021 = vst [vmem:[%s3337_s6 + $0x28] sm:$0xff] %v1949_v25  ;;  %v1473_v49 = vadd.f32 0.001143296, %v1472_v16  ;;  %v1829_v3 = vmul.f32 %v1797_v27, %v3938_v46 }
 0x1ad   : > { %v1290_v5 = vsel %vm3509_vm0, %v2272_v55, %v1286_v24  ;;  %v1398_v31 = vmul.f32 %v1397_v34, %v2981_v28  ;;  %v1438_v4 = vmul.f32 %v1437_v1, %v3048_v57  ;;  %v1333_v13 = vand.u32 2147483648, %v1321_v29 }
 0x1ae   : > { %v1295_v17 = vsel %vm3504_vm15, %v1294_v12, %v1290_v5  ;;  %2275 = vrcp.f32 %v3518_v39  ;;  %v1513_v0 = vadd.f32 0.001143296, %v1512_v41  ;;  %vm3530_vm2 = vcmp.eq.f32.partialorder %v1331_v22, 8.507059e+37  ;;  %v1951_v38 = vpop.f32.mrf.mxu1  ;;  %v3944_v5 = vld [vmem:[#allocation5_spill] sm:$0xff] }
 0x1af   : > { %v2274_v10 = vpop.eup %2273  ;;  %v1296_v44 = vmul.f32 %v1295_v17, %v3939_v36  ;;  %v1399_v55 = vadd.f32 0.4994258, %v1398_v31  ;;  %v1439_v15 = vadd.f32 0.4994258, %v1438_v4  ;;  %v1371_v52 = vand.u32 2147483647, %v3518_v39 }
 0x1b0   : > { %v1323_v45 = vmul.f32 %v2274_v10, %v1321_v29  ;;  %v1373_v11 = vand.u32 2147483648, %v3518_v39  ;;  %v1474_v16 = vmul.f32 %v1473_v49, %v3092_v6  ;;  %vm1328_vm3 = vweird.f32 %v2274_v10 }
 0x1b1   : > { %v2156_v7 = vclamps-f32 %v1296_v44, 1.0  ;;  %v1400_v27 = vmul.f32 %v1399_v55, %v2981_v28  ;;  %v1440_v59 = vmul.f32 %v1439_v15, %v3048_v57  ;;  %v1952_v12 = vadd.f32 %v3330_v60, %v1951_v38  ;;  %vm3554_vm6 = vmor %vm1327_vm1, %vm1328_vm3  ;;  %v3947_v38 = vld [vmem:[#allocation13_spill] sm:$0xff] }
 0x1b2   : > { %v1324_v63 = vsub.f32 1.0, %v1323_v45  ;;  %v1475_v14 = vadd.f32 0.014752088, %v1474_v16  ;;  %v1514_v25 = vmul.f32 %v1513_v0, %v3182_v8  ;;  %v1334_v24 = vor.u32 1.1754944e-38, %v1333_v13 }
 0x1b3   : > { %v1798_v41 = vadd.f32 1.0, %v2156_v7  ;;  %v3541_v22 = vadd.f32 1.0, %v1400_v27  ;;  %v3543_v34 = vadd.f32 1.0, %v1440_v59  ;;  %vm1367_vm4 = vweird.f32 %v3518_v39  ;;  %2022 = vst [vmem:[%s3337_s6 + $0x30] sm:$0xff] %v1952_v12 }
 0x1b4   : > { %v2276_v1 = vpop.eup %2275  ;;  %v1325_v49 = vmul.f32 %v2274_v10, %v1324_v63  ;;  %vm3546_vm5 = vcmp.eq.f32.partialorder %v1371_v52, 8.507059e+37  ;;  %v1374_v57 = vor.u32 1.1754944e-38, %v1373_v11  ;;  %v1476_v17 = vmul.f32 %v1475_v14, %v3092_v6 }
 0x1b5   : > { %v1830_v46 = vmul.f32 %v1798_v41, %v3944_v5  ;;  %v1363_v4 = vmul.f32 %v2276_v1, %v3518_v39  ;;  %2277 = vrcp.f32 %v3541_v22  ;;  %v1411_v0 = vand.u32 2147483647, %v3541_v22 }
 0x1b6   : > { %v1326_v13 = vadd.f32 %v2274_v10, %v1325_v49  ;;  %v1515_v36 = vadd.f32 0.014752088, %v1514_v25  ;;  %v1552_v44 = vmul.f32 3.8918573e-05, %v3196_v18  ;;  %vm1368_vm7 = vweird.f32 %v2276_v1 }
 0x1b7   : > { %v1852_v55 = vpack.c.bf16 %v1830_v46, %v1829_v3  ;;  %v1364_v15 = vsub.f32 1.0, %v1363_v4  ;;  %2279 = vrcp.f32 %v3543_v34  ;;  %vm1407_vm8 = vweird.f32 %v3541_v22  ;;  %v1953_v3 = vpop.f32.mrf.mxu1  ;;  %vm3575_vm10 = vmor %vm1367_vm4, %vm1368_vm7 }
 0x1b8   : > { %v1330_v29 = vsel %vm3554_vm6, %v2274_v10, %v1326_v13  ;;  %v1413_v45 = vand.u32 2147483648, %v3541_v22  ;;  %v1592_v52 = vmul.f32 3.8918573e-05, %v3234_v37  ;;  %vm1447_vm9 = vweird.f32 %v3543_v34 }
 0x1b9   : > { %1980 = vmatmul.bf16.gmra.mxu2 %v1852_v55  ;;  %v1335_v11 = vsel %vm3530_vm2, %v1334_v24, %v1330_v29  ;;  %v1365_v16 = vmul.f32 %v2276_v1, %v1364_v15  ;;  %v1477_v7 = vadd.f32 0.112945676, %v1476_v17  ;;  %vm3579_vm11 = vcmp.eq.f32.partialorder %v1411_v0, 8.507059e+37  ;;  %v3952_v15 = vld [vmem:[#allocation15_spill] sm:$0xff] }
 0x1ba   : > { %v1336_v27 = vmul.f32 %v1335_v11, %v3947_v38  ;;  %v1954_v40 = vadd.f32 %v3330_v60, %v1953_v3  ;;  %v1516_v63 = vmul.f32 %v1515_v36, %v3182_v8  ;;  %v1451_v25 = vand.u32 2147483647, %v3543_v34 }
 0x1bb   : > { %v2278_v12 = vpop.eup %2277  ;;  %v1366_v14 = vadd.f32 %v2276_v1, %v1365_v16  ;;  %v1478_v41 = vmul.f32 %v1477_v7, %v3092_v6  ;;  %v1553_v24 = vadd.f32 0.001143296, %v1552_v44  ;;  %v1453_v5 = vand.u32 2147483648, %v3543_v34 }
 0x1bc   : > { %v2157_v39 = vclamps-f32 %v1336_v27, 1.0  ;;  %v1403_v49 = vmul.f32 %v2278_v12, %v3541_v22  ;;  %2023 = vst [vmem:[%s3337_s6 + $0x38] sm:$0xff] %v1954_v40  ;;  %v1517_v46 = vadd.f32 0.112945676, %v1516_v63  ;;  %vm1408_vm12 = vweird.f32 %v2278_v12  ;;  %v3955_v63 = vld [vmem:[#allocation8_spill] sm:$0xff] }
 0x1bd   : > { %v2280_v31 = vpop.eup %2279  ;;  %v1370_v4 = vsel %vm3575_vm10, %v2276_v1, %v1366_v14  ;;  %v1479_v17 = vadd.f32 0.4994258, %v1478_v41  ;;  %v1554_v13 = vmul.f32 %v1553_v24, %v3196_v18  ;;  %v1593_v3 = vadd.f32 0.001143296, %v1592_v52  ;;  %vm3602_vm14 = vmor %vm1407_vm8, %vm1408_vm12 }
 0x1be   : > { %v1375_v0 = vsel %vm3546_vm5, %v1374_v57, %v1370_v4  ;;  %v1799_v36 = vadd.f32 1.0, %v2157_v39  ;;  %v1404_v44 = vsub.f32 1.0, %v1403_v49  ;;  %v1443_v55 = vmul.f32 %v2280_v31, %v3543_v34 }
 0x1bf   : > { %v1376_v29 = vmul.f32 %v1375_v0, %v3952_v15  ;;  %v1480_v11 = vmul.f32 %v1479_v17, %v3092_v6  ;;  %v1518_v16 = vmul.f32 %v1517_v46, %v3182_v8  ;;  %vm1448_vm13 = vweird.f32 %v2280_v31  ;;  %v3958_v17 = vld [vmem:[#allocation12_spill] sm:$0xff] }
 0x1c0   : > { %v1405_v7 = vmul.f32 %v2278_v12, %v1404_v44  ;;  %v1444_v1 = vsub.f32 1.0, %v1443_v55  ;;  %v1555_v38 = vadd.f32 0.014752088, %v1554_v13  ;;  %v1414_v57 = vor.u32 1.1754944e-38, %v1413_v45  ;;  %vm3609_vm15 = vmor %vm1447_vm9, %vm1448_vm13 }
 0x1c1   : > { %v2158_v27 = vclamps-f32 %v1376_v29, 1.0  ;;  %v1481_v10 = vadd.f32 1.0, %v1480_v11  ;;  %v1519_v40 = vadd.f32 0.4994258, %v1518_v16  ;;  %v1831_v6 = vmul.f32 %v1799_v36, %v3955_v63 }
 0x1c2   : > { %v1406_v14 = vadd.f32 %v2278_v12, %v1405_v7  ;;  %v1445_v41 = vmul.f32 %v2280_v31, %v1444_v1  ;;  %v1454_v52 = vor.u32 1.1754944e-38, %v1453_v5  ;;  %v1556_v22 = vmul.f32 %v1555_v38, %v3196_v18 }
 0x1c3   : > { %v1800_v24 = vadd.f32 1.0, %v2158_v27  ;;  %2281 = vrcp.f32 %v1481_v10  ;;  %v1594_v49 = vmul.f32 %v1593_v3, %v3234_v37  ;;  %vm1452_vm0 = vcmp.eq.f32.partialorder %v1451_v25, 8.507059e+37 }
 0x1c4   : > { %v1410_v45 = vsel %vm3602_vm14, %v2278_v12, %v1406_v14  ;;  %v1446_v46 = vadd.f32 %v2280_v31, %v1445_v41  ;;  %v1956_v4 = vpop.f32.mrf.mxu1  ;;  %v1520_v5 = vmul.f32 %v1519_v40, %v3182_v8  ;;  %v1491_v36 = vand.u32 2147483647, %v1481_v10 }
 0x1c5   : > { %v1832_v34 = vmul.f32 %v1800_v24, %v3958_v17  ;;  %v1415_v13 = vsel %vm3579_vm11, %v1414_v57, %v1410_v45  ;;  %v1957_v0 = vadd.f32 %v3330_v60, %v1956_v4  ;;  %v1493_v15 = vand.u32 2147483648, %v1481_v10 }
 0x1c6   : > { %v1416_v44 = vmul.f32 %v1415_v13, %v3267_v62  ;;  %v1450_v55 = vsel %vm3609_vm15, %v2280_v31, %v1446_v46  ;;  %v1521_v12 = vadd.f32 1.0, %v1520_v5  ;;  %v1557_v11 = vadd.f32 0.112945676, %v1556_v22 }
 0x1c7   : > { %v1853_v29 = vpack.c.bf16 %v1832_v34, %v1831_v6  ;;  %v1455_v25 = vsel %vm1452_vm0, %v1454_v52, %v1450_v55  ;;  %2024 = vst [vmem:[%s3337_s6 + $0x40] sm:$0xff] %v1957_v0  ;;  %v1595_v8 = vadd.f32 0.014752088, %v1594_v49  ;;  %v1632_v59 = vmul.f32 3.8918573e-05, %v3287_v47 }
 0x1c8   : > { %v2159_v16 = vclamps-f32 %v1416_v44, 1.0  ;;  %v1456_v3 = vmul.f32 %v1455_v25, %v3358_v23  ;;  %2283 = vrcp.f32 %v1521_v12  ;;  %v3629_v1 = vadd.f32 0.05243302, %v3481_v61  ;;  %v3964_v25 = vld [vmem:[#allocation17_spill] sm:$0xff] }
 0x1c9   : > { %v2282_v7 = vpop.eup %2281  ;;  %v1741_v62 = vmul.f32 2.1237322e-06, %v3516_v35  ;;  %1985 = vmatmul.bf16.gmra.mxu2 %v1853_v29  ;;  %v1558_v31 = vmul.f32 %v1557_v11, %v3196_v18  ;;  %v1596_v38 = vmul.f32 %v1595_v8, %v3234_v37  ;;  %vm1487_vm1 = vweird.f32 %v1481_v10 }
 0x1ca   : > { %v2160_v27 = vclamps-f32 %v1456_v3, 1.0  ;;  %v1483_v28 = vmul.f32 %v2282_v7, %v1481_v10  ;;  %vm3634_vm2 = vcmp.eq.f32.partialorder %v1491_v36, 8.507059e+37  ;;  %v1801_v23 = vadd.f32 1.0, %v2159_v16  ;;  %v3963_v36 = vld [vmem:[#allocation14_spill] sm:$0xff] }
 0x1cb   : > { %v1494_v40 = vor.u32 1.1754944e-38, %v1493_v15  ;;  %v1559_v63 = vadd.f32 0.4994258, %v1558_v31  ;;  %v1597_v6 = vadd.f32 0.112945676, %v1596_v38  ;;  %vm1488_vm3 = vweird.f32 %v2282_v7 }
 0x1cc   : > { %v1802_v61 = vadd.f32 1.0, %v2160_v27  ;;  %v1484_v14 = vsub.f32 1.0, %v1483_v28  ;;  %v1958_v41 = vpop.f32.mrf.mxu1  ;;  %v1633_v52 = vadd.f32 0.001143296, %v1632_v59  ;;  %v1672_v49 = vmul.f32 3.8918573e-05, %v3390_v20  ;;  %vm3644_vm5 = vmor %vm1487_vm1, %vm1488_vm3 }
 0x1cd   : > { %v1959_v24 = vadd.f32 %v3330_v60, %v1958_v41  ;;  %v1560_v39 = vmul.f32 %v1559_v63, %v3196_v18  ;;  %v1598_v22 = vmul.f32 %v1597_v6, %v3234_v37  ;;  %vm1527_vm4 = vweird.f32 %v1521_v12 }
 0x1ce   : > { %v2284_v45 = vpop.eup %2283  ;;  %v1485_v46 = vmul.f32 %v2282_v7, %v1484_v14  ;;  %v1531_v4 = vand.u32 2147483647, %v1521_v12  ;;  %v1634_v5 = vmul.f32 %v1633_v52, %v3287_v47  ;;  %v1533_v13 = vand.u32 2147483648, %v1521_v12 }
 0x1cf   : > { %v1523_v34 = vmul.f32 %v2284_v45, %v1521_v12  ;;  %2025 = vst [vmem:[%s3337_s6 + $0x48] sm:$0xff] %v1959_v24  ;;  %v3649_v0 = vadd.f32 1.0, %v1560_v39  ;;  %v1599_v18 = vadd.f32 0.4994258, %v1598_v22  ;;  %v1833_v44 = vmul.f32 %v1801_v23, %v3963_v36 }
 0x1d0   : > { %v1486_v55 = vadd.f32 %v2282_v7, %v1485_v46  ;;  %v1635_v15 = vadd.f32 0.014752088, %v1634_v5  ;;  %v1673_v29 = vadd.f32 0.001143296, %v1672_v49  ;;  %v1834_v11 = vmul.f32 %v1802_v61, %v3964_v25 }
 0x1d1   : > { %v1524_v8 = vsub.f32 1.0, %v1523_v34  ;;  %vm1528_vm6 = vweird.f32 %v2284_v45  ;;  %2285 = vrcp.f32 %v3649_v0  ;;  %v1600_v16 = vmul.f32 %v1599_v18, %v3234_v37 }
 0x1d2   : > { %v1490_v10 = vsel %vm3644_vm5, %v2282_v7, %v1486_v55  ;;  %v1636_v3 = vmul.f32 %v1635_v15, %v3287_v47  ;;  %v1712_v59 = vmul.f32 3.8918573e-05, %v3448_v53  ;;  %v3661_v31 = vmul.f32 %v3484_v33, %v3448_v53  ;;  %vm3667_vm7 = vmor %vm1527_vm4, %vm1528_vm6 }
 0x1d3   : > { %v1495_v38 = vsel %vm3634_vm2, %v1494_v40, %v1490_v10  ;;  %v1525_v27 = vmul.f32 %v2284_v45, %v1524_v8  ;;  %v1674_v28 = vmul.f32 %v1673_v29, %v3390_v20  ;;  %vm3671_vm8 = vcmp.eq.f32.partialorder %v1531_v4, 8.507059e+37 }
 0x1d4   : > { %v1534_v7 = vor.u32 1.1754944e-38, %v1533_v13  ;;  %v1601_v63 = vadd.f32 1.0, %v1600_v16  ;;  %v1637_v6 = vadd.f32 0.112945676, %v1636_v3  ;;  %v1496_v33 = vmul.f32 %v1495_v38, %v3435_v2 }
 0x1d5   : > { %v1526_v61 = vadd.f32 %v2284_v45, %v1525_v27  ;;  %v1573_v57 = vand.u32 2147483648, %v3649_v0  ;;  %v1675_v40 = vadd.f32 0.014752088, %v1674_v28  ;;  %v1742_v14 = vadd.f32 0.00028619796, %v1741_v62 }
 0x1d6   : > { %v1854_v41 = vpack.c.bf16 %v1834_v11, %v1833_v44  ;;  %2287 = vrcp.f32 %v1601_v63  ;;  %v1713_v12 = vadd.f32 0.001143296, %v1712_v59  ;;  %v1638_v39 = vmul.f32 %v1637_v6, %v3287_v47 }
 0x1d7   : > { %v2286_v52 = vpop.eup %2285  ;;  %v1530_v24 = vsel %vm3667_vm7, %v2284_v45, %v1526_v61  ;;  %v1676_v22 = vmul.f32 %v1675_v40, %v3390_v20  ;;  %v1752_v49 = vmul.f32 3.8918573e-05, %v3516_v35  ;;  %vm1567_vm9 = vweird.f32 %v3649_v0 }
 0x1d8   : > { %v1535_v2 = vsel %vm3671_vm8, %v1534_v7, %v1530_v24  ;;  %v1563_v46 = vmul.f32 %v2286_v52, %v3649_v0  ;;  %v1571_v62 = vand.u32 2147483647, %v3649_v0  ;;  %v2161_v4 = vclamps-f32 %v1496_v33, 1.0 }
 0x1d9   : > { %1990 = vmatmul.bf16.gmra.mxu2 %v1854_v41  ;;  %v1536_v5 = vmul.f32 %v1535_v2, %v3439_v58  ;;  %v1574_v45 = vor.u32 1.1754944e-38, %v1573_v57  ;;  %v1639_v17 = vadd.f32 0.4994258, %v1638_v39  ;;  %vm1568_vm10 = vweird.f32 %v2286_v52  ;;  %v3975_v2 = vld [vmem:[#allocation16_spill] sm:$0xff] }
 0x1da   : > { %v1564_v34 = vsub.f32 1.0, %v1563_v46  ;;  %v1677_v13 = vadd.f32 0.112945676, %v1676_v22  ;;  %v1714_v18 = vmul.f32 %v1713_v12, %v3448_v53  ;;  %vm1607_vm11 = vweird.f32 %v1601_v63  ;;  %vm3693_vm12 = vmor %vm1567_vm9, %vm1568_vm10 }
 0x1db   : > { %v2162_v36 = vclamps-f32 %v1536_v5, 1.0  ;;  %v1640_v44 = vmul.f32 %v1639_v17, %v3287_v47  ;;  %v1753_v55 = vadd.f32 0.001143296, %v1752_v49  ;;  %v1611_v25 = vand.u32 2147483647, %v1601_v63 }
 0x1dc   : > { %v2288_v15 = vpop.eup %2287  ;;  %v1565_v29 = vmul.f32 %v2286_v52, %v1564_v34  ;;  %v1678_v11 = vmul.f32 %v1677_v13, %v3390_v20  ;;  %v1715_v8 = vadd.f32 0.014752088, %v1714_v18  ;;  %v1803_v10 = vadd.f32 1.0, %v2161_v4 }
 0x1dd   : > { %v1603_v16 = vmul.f32 %v2288_v15, %v1601_v63  ;;  %v1613_v3 = vand.u32 2147483648, %v1601_v63  ;;  %v3697_v59 = vadd.f32 1.0, %v1640_v44  ;;  %v1804_v38 = vadd.f32 1.0, %v2162_v36 }
 0x1de   : > { %v1566_v47 = vadd.f32 %v2286_v52, %v1565_v29  ;;  %v1679_v27 = vadd.f32 0.4994258, %v1678_v11  ;;  %v1716_v28 = vmul.f32 %v1715_v8, %v3448_v53  ;;  %vm1608_vm13 = vweird.f32 %v2288_v15 }
 0x1df   : > { %v1604_v23 = vsub.f32 1.0, %v1603_v16  ;;  %2289 = vrcp.f32 %v3697_v59  ;;  %v1754_v37 = vmul.f32 %v1753_v55, %v3516_v35  ;;  %v1667_v0 = vmul.f32 %v3629_v1, %v3390_v20  ;;  %vm3715_vm0 = vmor %vm1607_vm11, %vm1608_vm13 }
 0x1e0   : > { %v1570_v7 = vsel %vm3693_vm12, %v2286_v52, %v1566_v47  ;;  %vm1572_vm14 = vcmp.eq.f32.partialorder %v1571_v62, 8.507059e+37  ;;  %v1680_v6 = vmul.f32 %v1679_v27, %v3390_v20  ;;  %v1743_v33 = vmul.f32 %v1742_v14, %v3516_v35 }
 0x1e1   : > { %v1605_v61 = vmul.f32 %v2288_v15, %v1604_v23  ;;  %vm3708_vm15 = vcmp.eq.f32.partialorder %v1611_v25, 8.507059e+37  ;;  %v1717_v40 = vadd.f32 0.112945676, %v1716_v28  ;;  %v1835_v41 = vmul.f32 %v1803_v10, %v3278_v30 }
 0x1e2   : > { %v1836_v12 = vmul.f32 %v1804_v38, %v3363_v42  ;;  %v1614_v52 = vor.u32 1.1754944e-38, %v1613_v3  ;;  %v3719_v24 = vadd.f32 1.0, %v1680_v6  ;;  %v1575_v39 = vsel %vm1572_vm14, %v1574_v45, %v1570_v7 }
 0x1e3   : > { %v1606_v14 = vadd.f32 %v2288_v15, %v1605_v61  ;;  %v1718_v22 = vmul.f32 %v1717_v40, %v3448_v53  ;;  %v1755_v49 = vadd.f32 0.014752088, %v1754_v37  ;;  %v3723_v46 = vmul.f32 0.5, %v3975_v2 }
 0x1e4   : > { %v1668_v62 = vadd.f32 0.18741608, %v1667_v0  ;;  %v1704_v30 = vadd.f32 0.0036580483, %v3661_v31  ;;  %2291 = vrcp.f32 %v3719_v24  ;;  %v1744_v63 = vadd.f32 0.0036580483, %v1743_v33 }
 0x1e5   : > { %v3727_v42 = vpop.eup %2289  ;;  %v1610_v4 = vsel %vm3715_vm0, %v2288_v15, %v1606_v14  ;;  %v1719_v5 = vadd.f32 0.4994258, %v1718_v22  ;;  %v1756_v45 = vmul.f32 %v1755_v49, %v3516_v35  ;;  %v462_v17 = vmul.f32 0.5, %v3200_v9  ;;  %v3789_v49 = vld [vmem:[%s3884_s4] ss:$0 sm:$0xff] }
 0x1e6   : > { %v1576_v34 = vmul.f32 %v1575_v39, %v3444_v51  ;;  %v1615_v13 = vsel %vm3708_vm15, %v1614_v52, %v1610_v4  ;;  %v1643_v31 = vmul.f32 %v3727_v42, %v3697_v59  ;;  %v1630_v18 = vadd.f32 1.1283791, %v3478_v19 }
 0x1e7   : > { %v1855_v36 = vpack.c.bf16 %v1836_v12, %v1835_v41  ;;  %v1616_v44 = vmul.f32 %v1615_v13, %v3465_v50  ;;  %v1720_v55 = vmul.f32 %v1719_v5, %v3448_v53  ;;  %v1669_v15 = vmul.f32 %v1668_v62, %v3390_v20 }
 0x1e8   : > { %v1705_v9 = vmul.f32 %v1704_v30, %v3448_v53  ;;  %v1961_v29 = vpop.f32.mrf.mxu1  ;;  %v1644_v51 = vsub.f32 1.0, %v1643_v31  ;;  %v1757_v25 = vadd.f32 0.112945676, %v1756_v45  ;;  %v1745_v11 = vmul.f32 %v1744_v63, %v3516_v35 }
 0x1e9   : > { %1995 = vmatmul.bf16.gmra.mxu2 %v1855_v36  ;;  %v1962_v8 = vadd.f32 %v3330_v60, %v1961_v29  ;;  %vm1647_vm1 = vweird.f32 %v3697_v59  ;;  %v3746_v19 = vadd.f32 1.0, %v1720_v55  ;;  %v2163_v10 = vclamps-f32 %v1576_v34, 1.0 }
 0x1ea   : > { %v2292_v50 = vpop.eup %2291  ;;  %v1645_v58 = vmul.f32 %v3727_v42, %v1644_v51  ;;  %v1651_v20 = vand.u32 2147483647, %v3697_v59  ;;  %v1758_v16 = vmul.f32 %v1757_v25, %v3516_v35  ;;  %v2164_v3 = vclamps-f32 %v1616_v44, 1.0 }
 0x1eb   : > { %2026 = vst [vmem:[%s3337_s6 + $0x50] sm:$0xff] %v1962_v8  ;;  %vm1648_vm2 = vweird.f32 %v3727_v42  ;;  %v1683_v38 = vmul.f32 %v2292_v50, %v3719_v24  ;;  %2293 = vrcp.f32 %v3746_v19  ;;  %v1653_v60 = vand.u32 2147483648, %v3697_v59 }
 0x1ec   : > { %vm1687_vm3 = vweird.f32 %v3719_v24  ;;  %v1691_v47 = vand.u32 2147483647, %v3719_v24  ;;  %v1693_v27 = vand.u32 2147483648, %v3719_v24  ;;  %v1646_v28 = vadd.f32 %v3727_v42, %v1645_v58  ;;  %vm3765_vm5 = vmor %vm1647_vm1, %vm1648_vm2 }
 0x1ed   : > { %v1684_v23 = vsub.f32 1.0, %v1683_v38  ;;  %vm1688_vm4 = vweird.f32 %v2292_v50  ;;  %v1759_v37 = vadd.f32 0.4994258, %v1758_v16  ;;  %v1631_v0 = vmul.f32 %v1630_v18, %v3250_v54 }
 0x1ee   : > { %v1670_v7 = vadd.f32 1.1283791, %v1669_v15  ;;  %v1706_v6 = vadd.f32 0.05243302, %v1705_v9  ;;  %v1746_v33 = vadd.f32 0.05243302, %v1745_v11  ;;  %vm3776_vm7 = vmor %vm1687_vm3, %vm1688_vm4  ;;  %v1650_v24 = vsel %vm3765_vm5, %v3727_v42, %v1646_v28 }
 0x1ef   : > { %v1805_v57 = vadd.f32 1.0, %v2163_v10  ;;  %v1806_v40 = vadd.f32 1.0, %v2164_v3  ;;  %v1685_v41 = vmul.f32 %v2292_v50, %v1684_v23  ;;  %v1760_v12 = vmul.f32 %v1759_v37, %v3516_v35 }
 0x1f0   : > { %v1963_v1 = vpop.f32.mrf.mxu1  ;;  %vm3770_vm6 = vcmp.eq.f32.partialorder %v1651_v20, 8.507059e+37  ;;  %v1654_v54 = vor.u32 1.1754944e-38, %v1653_v60  ;;  %vm3780_vm8 = vcmp.eq.f32.partialorder %v1691_v47, 8.507059e+37  ;;  %v1694_v14 = vor.u32 1.1754944e-38, %v1693_v27 }
 0x1f1   : > { %v3784_v22 = vpop.eup %2293  ;;  %v1964_v2 = vadd.f32 %v3789_v49, %v1963_v1  ;;  %v1686_v62 = vadd.f32 %v2292_v50, %v1685_v41  ;;  %v1761_v30 = vadd.f32 1.0, %v1760_v12  ;;  %v1671_v63 = vmul.f32 %v1670_v7, %v3349_v43 }
 0x1f2   : > { %v1707_v4 = vmul.f32 %v1706_v6, %v3448_v53  ;;  %v1747_v5 = vmul.f32 %v1746_v33, %v3516_v35  ;;  %v1723_v45 = vmul.f32 %v3784_v22, %v3746_v19  ;;  %v1837_v34 = vmul.f32 %v1805_v57, %v3723_v46 }
 0x1f3   : > { %v1838_v13 = vmul.f32 %v1806_v40, %v462_v17  ;;  %2027 = vst [vmem:[%s3337_s6 + $0x58] sm:$0xff] %v1964_v2  ;;  %v1690_v31 = vsel %vm3776_vm7, %v2292_v50, %v1686_v62  ;;  %2295 = vrcp.f32 %v1761_v30  ;;  %v1655_v42 = vsel %vm3770_vm6, %v1654_v54, %v1650_v24  ;;  %v3988_v24 = vld [vmem:[#allocation10_spill] sm:$0xff] }
 0x1f4   : > { %v1695_v43 = vsel %vm3780_vm8, %v1694_v14, %v1690_v31  ;;  %v1724_v18 = vsub.f32 1.0, %v1723_v45  ;;  %v1708_v36 = vadd.f32 0.18741608, %v1707_v4  ;;  %v1748_v44 = vadd.f32 0.18741608, %v1747_v5 }
 0x1f5   : > { %v1856_v55 = vpack.c.bf16 %v1838_v13, %v1837_v34  ;;  %v1656_v15 = vmul.f32 %v1655_v42, %v1631_v0  ;;  %v1696_v9 = vmul.f32 %v1695_v43, %v1671_v63  ;;  %vm1727_vm9 = vweird.f32 %v3746_v19 }
 0x1f6   : > { %v1725_v51 = vmul.f32 %v3784_v22, %v1724_v18  ;;  %v1709_v25 = vmul.f32 %v1708_v36, %v3448_v53  ;;  %v1749_v11 = vmul.f32 %v1748_v44, %v3516_v35  ;;  %vm1728_vm10 = vweird.f32 %v3784_v22 }
 0x1f7   : > { %v2165_v50 = vclamps-f32 %v1656_v15, 1.0  ;;  %v2166_v10 = vclamps-f32 %v1696_v9, 1.0  ;;  %v1733_v58 = vand.u32 2147483648, %v3746_v19  ;;  %vm1767_vm11 = vweird.f32 %v1761_v30  ;;  %vm3822_vm13 = vmor %vm1727_vm9, %vm1728_vm10 }
 0x1f8   : > { %v1966_v46 = vpop.f32.mrf.mxu1  ;;  %v1773_v16 = vand.u32 2147483648, %v1761_v30  ;;  %v1726_v3 = vadd.f32 %v3784_v22, %v1725_v51  ;;  %v1731_v53 = vand.u32 2147483647, %v3746_v19  ;;  %v1771_v38 = vand.u32 2147483647, %v1761_v30 }
 0x1f9   : > { %v2296_v17 = vpop.eup %2295  ;;  %2000 = vmatmul.bf16.gmra.mxu2 %v1856_v55  ;;  %v1967_v29 = vadd.f32 %v3789_v49, %v1966_v46  ;;  %v463_v35 = vmul.f32 0.5, %v3237_v48  ;;  %v464_v60 = vmul.f32 0.5, %v3325_v56  ;;  %v1710_v28 = vadd.f32 1.1283791, %v1709_v25 }
 0x1fa   : > { %v1763_v8 = vmul.f32 %v2296_v17, %v1761_v30  ;;  %vm1768_vm12 = vweird.f32 %v2296_v17  ;;  %v1750_v23 = vadd.f32 1.1283791, %v1749_v11  ;;  %v1807_v37 = vadd.f32 1.0, %v2165_v50 }
 0x1fb   : > { %2028 = vst [vmem:[%s3337_s6 + $0x60] sm:$0xff] %v1967_v29  ;;  %v1808_v0 = vadd.f32 1.0, %v2166_v10  ;;  %vm3826_vm14 = vmor %vm1767_vm11, %vm1768_vm12  ;;  %v1734_v48 = vor.u32 1.1754944e-38, %v1733_v58  ;;  %v1774_v56 = vor.u32 1.1754944e-38, %v1773_v16  ;;  %v1730_v61 = vsel %vm3822_vm13, %v3784_v22, %v1726_v3 }
 0x1fc   : > { %v1764_v20 = vsub.f32 1.0, %v1763_v8  ;;  %vm1732_vm15 = vcmp.eq.f32.partialorder %v1731_v53, 8.507059e+37  ;;  %vm1772_vm0 = vcmp.eq.f32.partialorder %v1771_v38, 8.507059e+37  ;;  %v1711_v40 = vmul.f32 %v1710_v28, %v3412_v21 }
 0x1fd   : > { %v1751_v41 = vmul.f32 %v1750_v23, %v3493_v32  ;;  %v1839_v12 = vmul.f32 %v1807_v37, %v463_v35  ;;  %v1840_v1 = vmul.f32 %v1808_v0, %v464_v60  ;;  %v1735_v52 = vsel %vm1732_vm15, %v1734_v48, %v1730_v61 }
 0x1fe   : > { %v1765_v27 = vmul.f32 %v2296_v17, %v1764_v20  ;;  %v1736_v39 = vmul.f32 %v1735_v52, %v1711_v40  ;;  %v465_v62 = vmul.f32 0.5, %v3988_v24  ;;  %v466_v21 = vmul.f32 0.5, %v3469_v26 }
 0x1ff   : > { %v1857_v59 = vpack.c.bf16 %v1840_v1, %v1839_v12 }
 0x200   : > { %v1968_v6 = vpop.f32.mrf.mxu1  ;;  %v1766_v33 = vadd.f32 %v2296_v17, %v1765_v27  ;;  %v2167_v22 = vclamps-f32 %v1736_v39, 1.0 }
 0x201   : > { %v1969_v19 = vadd.f32 %v3789_v49, %v1968_v6 }
 0x202   : > { %v1770_v57 = vsel %vm3826_vm14, %v2296_v17, %v1766_v33  ;;  %v1809_v30 = vadd.f32 1.0, %v2167_v22 }
 0x203   : > { %2029 = vst [vmem:[%s3337_s6 + $0x68] sm:$0xff] %v1969_v19  ;;  %v1775_v54 = vsel %vm1772_vm0, %v1774_v56, %v1770_v57 }
 0x204   : > { %v1776_v14 = vmul.f32 %v1775_v54, %v1751_v41  ;;  %v1841_v4 = vmul.f32 %v1809_v30, %v465_v62 }
 0x206   : > { %v2168_v2 = vclamps-f32 %v1776_v14, 1.0 }
 0x208   : > { %v1810_v32 = vadd.f32 1.0, %v2168_v2 }
 0x209   : > { %2005 = vmatmul.bf16.gmra.mxu2 %v1857_v59 }
 0x20a   : > { %v1842_v5 = vmul.f32 %v1810_v32, %v466_v21 }
 0x20c   : > { %v1858_v34 = vpack.c.bf16 %v1842_v5, %v1841_v4 }
 0x213   : > { %v1971_v63 = vpop.f32.mrf.mxu1 }
 0x214   : > { %v1972_v45 = vadd.f32 %v3789_v49, %v1971_v63 }
 0x216   : > { %2030 = vst [vmem:[%s3337_s6 + $0x70] sm:$0xff] %v1972_v45 }
 0x219   : > { %2010 = vmatmul.bf16.gmra.mxu2 %v1858_v34 }
 0x21b   : > { %v1973_v13 = vpop.f32.mrf.mxu1 }
 0x21c   : > { %v1974_v31 = vadd.f32 %v3789_v49, %v1973_v13 }
 0x21e   : > { %2031 = vst [vmem:[%s3337_s6 + $0x78] sm:$0xff] %v1974_v31 }
 0x224   : > { %v1976_v42 = vpop.f32.mrf.mxu2 }
 0x225   : > { %v1977_v26 = vadd.f32 %v3789_v49, %v1976_v42 }
 0x227   : > { %2032 = vst [vmem:[%s3337_s6 + $0x80] sm:$0xff] %v1977_v26 }
 0x22c   : > { %v1978_v43 = vpop.f32.mrf.mxu2 }
 0x22d   : > { %v1979_v18 = vadd.f32 %v3789_v49, %v1978_v43 }
 0x22f   : > { %2033 = vst [vmem:[%s3337_s6 + $0x88] sm:$0xff] %v1979_v18 }
 0x23c   : > { %v1981_v36 = vpop.f32.mrf.mxu2 }
 0x23d   : > { %v1982_v44 = vadd.f32 %v3789_v49, %v1981_v36 }
 0x23f   : > { %2034 = vst [vmem:[%s3337_s6 + $0x90] sm:$0xff] %v1982_v44 }
 0x244   : > { %v1983_v55 = vpop.f32.mrf.mxu2 }
 0x245   : > { %v1984_v15 = vadd.f32 %v3789_v49, %v1983_v55 }
 0x247   : > { %2035 = vst [vmem:[%s3337_s6 + $0x98] sm:$0xff] %v1984_v15 }
 0x24c   : > { %v1986_v9 = vpop.f32.mrf.mxu2 }
 0x24d   : > { %v1987_v46 = vadd.f32 %v3789_v49, %v1986_v9 }
 0x24f   : > { %2036 = vst [vmem:[%s3337_s6 + $0xa0] sm:$0xff] %v1987_v46 }
 0x254   : > { %v1988_v17 = vpop.f32.mrf.mxu2 }
 0x255   : > { %v1989_v29 = vadd.f32 %v3789_v49, %v1988_v17 }
 0x257   : > { %2037 = vst [vmem:[%s3337_s6 + $0xa8] sm:$0xff] %v1989_v29 }
 0x25c   : > { %v1991_v51 = vpop.f32.mrf.mxu2 }
 0x25d   : > { %v1992_v25 = vadd.f32 %v3789_v49, %v1991_v51 }
 0x25f   : > { %2038 = vst [vmem:[%s3337_s6 + $0xb0] sm:$0xff] %v1992_v25 }
 0x264   : > { %v1993_v11 = vpop.f32.mrf.mxu2 }
 0x265   : > { %v1994_v8 = vadd.f32 %v3789_v49, %v1993_v11 }
 0x267   : > { %2039 = vst [vmem:[%s3337_s6 + $0xb8] sm:$0xff] %v1994_v8 }
 0x26c   : > { %v1996_v50 = vpop.f32.mrf.mxu2 }
 0x26d   : > { %v1997_v10 = vadd.f32 %v3789_v49, %v1996_v50 }
 0x26f   : > { %2040 = vst [vmem:[%s3337_s6 + $0xc0] sm:$0xff] %v1997_v10 }
 0x274   : > { %v1998_v58 = vpop.f32.mrf.mxu2 }
 0x275   : > { %v1999_v20 = vadd.f32 %v3789_v49, %v1998_v58 }
 0x277   : > { %2041 = vst [vmem:[%s3337_s6 + $0xc8] sm:$0xff] %v1999_v20 }
 0x27c   : > { %v2001_v16 = vpop.f32.mrf.mxu2 }
 0x27d   : > { %v2002_v3 = vadd.f32 %v3789_v49, %v2001_v16 }
 0x27f   : > { %2042 = vst [vmem:[%s3337_s6 + $0xd0] sm:$0xff] %v2002_v3 }
 0x284   : > { %v2003_v53 = vpop.f32.mrf.mxu2 }
 0x285   : > { %v2004_v38 = vadd.f32 %v3789_v49, %v2003_v53 }
 0x287   : > { %2043 = vst [vmem:[%s3337_s6 + $0xd8] sm:$0xff] %v2004_v38 }
 0x28c   : > { %v2006_v35 = vpop.f32.mrf.mxu2 }
 0x28d   : > { %v2007_v60 = vadd.f32 %v3789_v49, %v2006_v35 }
 0x28f   : > { %2044 = vst [vmem:[%s3337_s6 + $0xe0] sm:$0xff] %v2007_v60 }
 0x294   : > { %v2008_v47 = vpop.f32.mrf.mxu2 }
 0x295   : > { %v2009_v27 = vadd.f32 %v3789_v49, %v2008_v47 }
 0x297   : > { %2045 = vst [vmem:[%s3337_s6 + $0xe8] sm:$0xff] %v2009_v27 }
 0x29c   : > { %v2011_v28 = vpop.f32.mrf.mxu2 }
 0x29d   : > { %v2012_v23 = vadd.f32 %v3789_v49, %v2011_v28 }
 0x29f   : > { %2046 = vst [vmem:[%s3337_s6 + $0xf0] sm:$0xff] %v2012_v23 }
 0x2a4   : > { %v2013_v37 = vpop.f32.mrf.mxu2 }
 0x2a5   : > { %v2014_v0 = vadd.f32 %v3789_v49, %v2013_v37 }
 0x2a7   : > { %2047 = vst [vmem:[%s3337_s6 + $0xf8] sm:$0xff] %v2014_v0 }
 0x2a8 PF: > { %s15_s18 = sadd.s32 1, %s2306_s18  }
 0x2a9   : > { %p12_p4 = scmp.ge.s32.totalorder %s15_s18, 4  }
 0x2ab   :  { %14 = sbr.rel (!%p12_p4) target bundleno = 1 (0x1), region = 70 }

</bundles_post_ra>
